<compile_context>
chip_gen: v5e
topology: v5e:2x2
jax: 0.10.0
libtpu: 0.0.40
codegen_flags: <defaults>
</compile_context>

<pallas_src>
import math

import jax
import jax.numpy as jnp
from jax import lax
from jax.experimental import pallas as pl

# ---- small deterministic config ----
B, T, C = 2, 8, 32
N_HEAD = 4
HD = C // N_HEAD          # 8
HEAD_IDX = 1
HEAD_IDXS = (0, 2, 3)     # len == N_HEAD - 1 so concat gives N_HEAD heads
PERMUTATION = (2, 0, 3, 1)
LN_EPS = 1e-5
INV_SQRT2 = 1.0 / math.sqrt(2.0)

# Resolve the head plumbing at trace time: pre-permutation concat order is
# [special(head HEAD_IDX from z1/z2/z3), z-head HEAD_IDXS...]; apply PERMUTATION.
_CONCAT_SRCS = [("special", HEAD_IDX)] + [("z", h) for h in HEAD_IDXS]
_FINAL_SRCS = tuple(_CONCAT_SRCS[p] for p in PERMUTATION)   # static list of sources


# ----------------------- single fused kernel for the whole block -----------------------
def _block_kernel(x_ref, z1_ref, z2_ref, z3_ref, z_ref,
                  wa_ref, ba_ref, wp_ref, bp_ref, g_ref, bt_ref,
                  wfc_ref, bfc_ref, wp2_ref, bp2_ref, o_ref):
    wa = wa_ref[...]          # (C, 3C)   hoisted loads (no per-head re-broadcast)
    ba = ba_ref[...]          # (1, 3C)

    # --- c_attn projections, kept in VMEM/vregs ---
    qkvz = jnp.dot(z_ref[...], wa, preferred_element_type=jnp.float32) + ba   # (N, 3C)
    qkv1 = jnp.dot(z1_ref[...], wa, preferred_element_type=jnp.float32) + ba
    qkv2 = jnp.dot(z2_ref[...], wa, preferred_element_type=jnp.float32) + ba
    qkv3 = jnp.dot(z3_ref[...], wa, preferred_element_type=jnp.float32) + ba

    # --- static head selection (columns h*HD:(h+1)*HD of each q/k/v slab) ---
    q_heads, k_heads, v_heads = [], [], []
    for kind, h in _FINAL_SRCS:
        qlo = 0 * C + h * HD
        klo = 1 * C + h * HD
        vlo = 2 * C + h * HD
        if kind == "special":
            q_heads.append(qkv1[:, qlo:qlo + HD])   # q from z1, head HEAD_IDX
            k_heads.append(qkv2[:, klo:klo + HD])   # k from z2, head HEAD_IDX
            v_heads.append(qkv3[:, vlo:vlo + HD])   # v from z3, head HEAD_IDX
        else:
            q_heads.append(qkvz[:, qlo:qlo + HD])   # q/k/v from z, head h
            k_heads.append(qkvz[:, klo:klo + HD])
            v_heads.append(qkvz[:, vlo:vlo + HD])

    # --- causal attention, all B*H pairs unrolled in this single grid step ---
    scale = 1.0 / math.sqrt(HD)            # 1/sqrt(head_dim), matches kt.size(-1)
    row = lax.broadcasted_iota(jnp.int32, (T, T), 0)
    col = lax.broadcasted_iota(jnp.int32, (T, T), 1)
    causal = row >= col                    # built once (not once per head)

    y_rows = []
    for b in range(B):
        rs = b * T
        outs = []
        for hh in range(N_HEAD):
            q = q_heads[hh][rs:rs + T, :]          # (T, HD)
            k = k_heads[hh][rs:rs + T, :]
            v = v_heads[hh][rs:rs + T, :]
            s = jnp.dot(q, k.T, preferred_element_type=jnp.float32) * scale
            s = jnp.where(causal, s, -jnp.inf)     # diagonal always unmasked -> no NaN
            m = jnp.max(s, axis=-1, keepdims=True)
            p = jnp.exp(s - m)
            l = jnp.sum(p, axis=-1, keepdims=True)
            # fold normalization into one reciprocal per row (exact, within f32)
            outs.append(jnp.dot(p, v, preferred_element_type=jnp.float32)
                        * pl.reciprocal(l))
        y_rows.append(jnp.concatenate(outs, axis=-1))      # (T, C)
    y = jnp.concatenate(y_rows, axis=0)                    # (B*T, C)

    # --- c_proj + residual (resid_dropout = identity) ---
    x = x_ref[...]
    h = x + jnp.dot(y, wp_ref[...], preferred_element_type=jnp.float32) + bp_ref[...]

    # --- ln_2 ---
    mu = jnp.mean(h, axis=-1, keepdims=True)
    var = jnp.mean((h - mu) ** 2, axis=-1, keepdims=True)
    hn = (h - mu) * lax.rsqrt(var + LN_EPS) * g_ref[...] + bt_ref[...]

    # --- mlp: c_fc -> GELU(exact, erf) -> c_proj, + residual ---
    a = jnp.dot(hn, wfc_ref[...], preferred_element_type=jnp.float32) + bfc_ref[...]
    gelu = 0.5 * a * (1.0 + lax.erf(a * INV_SQRT2))
    m2 = jnp.dot(gelu, wp2_ref[...], preferred_element_type=jnp.float32) + bp2_ref[...]
    o_ref[...] = h + m2


# ---------------------------------- wrapper ----------------------------------
def custom_block_forward(x, z1, z2, z3, z, params):
    n = B * T
    flat = lambda a: a.reshape(n, C)
    full = lambda shape: pl.BlockSpec(shape, lambda i, _s=shape: (0,) * len(_s))
    out = pl.pallas_call(
        _block_kernel,
        out_shape=jax.ShapeDtypeStruct((n, C), jnp.float32),
        grid=(1,),
        in_specs=[
            full((n, C)), full((n, C)), full((n, C)), full((n, C)), full((n, C)),
            full((C, 3 * C)), full((1, 3 * C)),
            full((C, C)), full((1, C)),
            full((1, C)), full((1, C)),
            full((C, 4 * C)), full((1, 4 * C)),
            full((4 * C, C)), full((1, C)),
        ],
        out_specs=full((n, C)),
        # NOTE: output is (16, 32) < 128 lanes -> masked store, but it is a single
        # 2 KB store in a fused kernel; an in-kernel (16,32)->(4,128) relayout was
        # judged not worth the lowering risk at this size.
    )(flat(x), flat(z1), flat(z2), flat(z3), flat(z),
      params["w_attn"], params["b_attn"], params["w_proj"], params["b_proj"],
      params["ln_g"], params["ln_b"], params["w_fc"], params["b_fc"],
      params["w_proj2"], params["b_proj2"])
    return out.reshape(B, T, C)


# ------------------------------- reference (pure JAX) ----------------------------
def reference_forward(x, z1, z2, z3, z, p):
    def lin(a, w, b):
        return a @ w + b[0]

    def heads(a):
        return a.reshape(B, T, N_HEAD, HD).transpose(0, 2, 1, 3)

    qkv1 = lin(z1, p["w_attn"], p["b_attn"])
    qkv2 = lin(z2, p["w_attn"], p["b_attn"])
    qkv3 = lin(z3, p["w_attn"], p["b_attn"])
    qkvz = lin(z, p["w_attn"], p["b_attn"])
    q1 = heads(qkv1[..., :C]); k2 = heads(qkv2[..., C:2 * C]); v3 = heads(qkv3[..., 2 * C:])
    qt = heads(qkvz[..., :C]); kt = heads(qkvz[..., C:2 * C]); vt = heads(qkvz[..., 2 * C:])
    hidxs = jnp.array(HEAD_IDXS); perm = jnp.array(PERMUTATION)
    qf = jnp.concatenate([q1[:, HEAD_IDX:HEAD_IDX + 1], qt[:, hidxs]], axis=1)[:, perm]
    kf = jnp.concatenate([k2[:, HEAD_IDX:HEAD_IDX + 1], kt[:, hidxs]], axis=1)[:, perm]
    vf = jnp.concatenate([v3[:, HEAD_IDX:HEAD_IDX + 1], vt[:, hidxs]], axis=1)[:, perm]
    att = (qf @ jnp.swapaxes(kf, -2, -1)) / math.sqrt(HD)
    mask = jnp.tril(jnp.ones((T, T), bool))
    att = jnp.where(mask[None, None], att, -jnp.inf)
    att = jax.nn.softmax(att, axis=-1)
    y = (att @ vf).transpose(0, 2, 1, 3).reshape(B, T, C)
    h = x + lin(y, p["w_proj"], p["b_proj"])
    mu = h.mean(-1, keepdims=True)
    var = ((h - mu) ** 2).mean(-1, keepdims=True)
    hn = (h - mu) / jnp.sqrt(var + LN_EPS) * p["ln_g"][0] + p["ln_b"][0]
    a = lin(hn, p["w_fc"], p["b_fc"])
    g = 0.5 * a * (1.0 + lax.erf(a * INV_SQRT2))
    m = lin(g, p["w_proj2"], p["b_proj2"])
    return h + m


# ------------------------------------ params --------------------------------------
def init_params(key):
    ks = jax.random.split(key, 10)
    s = 0.05
    f32 = jnp.float32
    return dict(
        w_attn=s * jax.random.normal(ks[0], (C, 3 * C), f32),
        b_attn=s * jax.random.normal(ks[1], (1, 3 * C), f32),
        w_proj=s * jax.random.normal(ks[2], (C, C), f32),
        b_proj=s * jax.random.normal(ks[3], (1, C), f32),
        ln_g=jnp.ones((1, C), f32) + 0.1 * jax.random.normal(ks[4], (1, C), f32),
        ln_b=0.1 * jax.random.normal(ks[5], (1, C), f32),
        w_fc=s * jax.random.normal(ks[6], (C, 4 * C), f32),
        b_fc=s * jax.random.normal(ks[7], (1, 4 * C), f32),
        w_proj2=s * jax.random.normal(ks[8], (4 * C, C), f32),
        b_proj2=s * jax.random.normal(ks[9], (1, C), f32),
    )


if __name__ == "__main__":
    key = jax.random.PRNGKey(0)
    kx, k1, k2, k3, kz, kp = jax.random.split(key, 6)
    x = jax.random.normal(kx, (B, T, C), jnp.float32)
    z1 = jax.random.normal(k1, (B, T, C), jnp.float32)
    z2 = jax.random.normal(k2, (B, T, C), jnp.float32)
    z3 = jax.random.normal(k3, (B, T, C), jnp.float32)
    z = jax.random.normal(kz, (B, T, C), jnp.float32)
    params = init_params(kp)

    out = custom_block_forward(x, z1, z2, z3, z, params)
    out = jax.block_until_ready(out)

    ref = jax.block_until_ready(reference_forward(x, z1, z2, z3, z, params))
    assert out.shape == (B, T, C)
    assert jnp.allclose(out, ref, rtol=1e-4, atol=1e-4), (
        float(jnp.max(jnp.abs(out - ref))))
    print("KERNEL_OK")
</pallas_src>

<mosaic_0001>
module attributes {stable_mosaic.version = 11 : i64} {
  func.func @_block_kernel(%arg0: i32, %arg1: memref<16x32xf32, #tpu.memory_space<vmem>>, %arg2: memref<16x32xf32, #tpu.memory_space<vmem>>, %arg3: memref<16x32xf32, #tpu.memory_space<vmem>>, %arg4: memref<16x32xf32, #tpu.memory_space<vmem>>, %arg5: memref<16x32xf32, #tpu.memory_space<vmem>>, %arg6: memref<32x96xf32, #tpu.memory_space<vmem>>, %arg7: memref<1x96xf32, #tpu.memory_space<vmem>>, %arg8: memref<32x32xf32, #tpu.memory_space<vmem>>, %arg9: memref<1x32xf32, #tpu.memory_space<vmem>>, %arg10: memref<1x32xf32, #tpu.memory_space<vmem>>, %arg11: memref<1x32xf32, #tpu.memory_space<vmem>>, %arg12: memref<32x128xf32, #tpu.memory_space<vmem>>, %arg13: memref<1x128xf32, #tpu.memory_space<vmem>>, %arg14: memref<128x32xf32, #tpu.memory_space<vmem>>, %arg15: memref<1x32xf32, #tpu.memory_space<vmem>>, %arg16: memref<16x32xf32, #tpu.memory_space<vmem>>) attributes {dimension_semantics = [#tpu.dimension_semantics<arbitrary>], iteration_bounds = array<i64: 1>, scalar_prefetch = 0 : i64, scratch_operands = 0 : i64, tpu.core_type = #tpu.core_type<tc>, window_params = [{pipeline_mode = #tpu.pipeline_mode<synchronous>, transform_indices = @transform_0, window_bounds = array<i64: 16, 32>}, {pipeline_mode = #tpu.pipeline_mode<synchronous>, transform_indices = @transform_1, window_bounds = array<i64: 16, 32>}, {pipeline_mode = #tpu.pipeline_mode<synchronous>, transform_indices = @transform_2, window_bounds = array<i64: 16, 32>}, {pipeline_mode = #tpu.pipeline_mode<synchronous>, transform_indices = @transform_3, window_bounds = array<i64: 16, 32>}, {pipeline_mode = #tpu.pipeline_mode<synchronous>, transform_indices = @transform_4, window_bounds = array<i64: 16, 32>}, {pipeline_mode = #tpu.pipeline_mode<synchronous>, transform_indices = @transform_5, window_bounds = array<i64: 32, 96>}, {pipeline_mode = #tpu.pipeline_mode<synchronous>, transform_indices = @transform_6, window_bounds = array<i64: 1, 96>}, {pipeline_mode = #tpu.pipeline_mode<synchronous>, transform_indices = @transform_7, window_bounds = array<i64: 32, 32>}, {pipeline_mode = #tpu.pipeline_mode<synchronous>, transform_indices = @transform_8, window_bounds = array<i64: 1, 32>}, {pipeline_mode = #tpu.pipeline_mode<synchronous>, transform_indices = @transform_9, window_bounds = array<i64: 1, 32>}, {pipeline_mode = #tpu.pipeline_mode<synchronous>, transform_indices = @transform_10, window_bounds = array<i64: 1, 32>}, {pipeline_mode = #tpu.pipeline_mode<synchronous>, transform_indices = @transform_11, window_bounds = array<i64: 32, 128>}, {pipeline_mode = #tpu.pipeline_mode<synchronous>, transform_indices = @transform_12, window_bounds = array<i64: 1, 128>}, {pipeline_mode = #tpu.pipeline_mode<synchronous>, transform_indices = @transform_13, window_bounds = array<i64: 128, 32>}, {pipeline_mode = #tpu.pipeline_mode<synchronous>, transform_indices = @transform_14, window_bounds = array<i64: 1, 32>}, {pipeline_mode = #tpu.pipeline_mode<synchronous>, transform_indices = @transform_15, window_bounds = array<i64: 16, 32>}]} {
    %c0 = arith.constant 0 : index
    %c0_0 = arith.constant 0 : index
    %0 = vector.load %arg6[%c0, %c0_0] : memref<32x96xf32, #tpu.memory_space<vmem>>, vector<32x96xf32>
    %c0_1 = arith.constant 0 : index
    %c0_2 = arith.constant 0 : index
    %1 = vector.load %arg7[%c0_1, %c0_2] : memref<1x96xf32, #tpu.memory_space<vmem>>, vector<1x96xf32>
    %c0_3 = arith.constant 0 : index
    %c0_4 = arith.constant 0 : index
    %2 = vector.load %arg5[%c0_3, %c0_4] : memref<16x32xf32, #tpu.memory_space<vmem>>, vector<16x32xf32>
    %cst = arith.constant dense<0.000000e+00> : vector<16x96xf32>
    %3 = tpu.matmul %2, %0, %cst {dimension_numbers = #tpu.dot_dimension_numbers<[1], [0], [0], [1], [0, 0, 1, 1], [], []>} : vector<16x32xf32>, vector<32x96xf32>, vector<16x96xf32> -> vector<16x96xf32>
    %4 = vector.broadcast %1 : vector<1x96xf32> to vector<16x96xf32>
    %5 = arith.addf %3, %4 : vector<16x96xf32>
    %c0_5 = arith.constant 0 : index
    %c0_6 = arith.constant 0 : index
    %6 = vector.load %arg2[%c0_5, %c0_6] : memref<16x32xf32, #tpu.memory_space<vmem>>, vector<16x32xf32>
    %cst_7 = arith.constant dense<0.000000e+00> : vector<16x96xf32>
    %7 = tpu.matmul %6, %0, %cst_7 {dimension_numbers = #tpu.dot_dimension_numbers<[1], [0], [0], [1], [0, 0, 1, 1], [], []>} : vector<16x32xf32>, vector<32x96xf32>, vector<16x96xf32> -> vector<16x96xf32>
    %8 = vector.broadcast %1 : vector<1x96xf32> to vector<16x96xf32>
    %9 = arith.addf %7, %8 : vector<16x96xf32>
    %c0_8 = arith.constant 0 : index
    %c0_9 = arith.constant 0 : index
    %10 = vector.load %arg3[%c0_8, %c0_9] : memref<16x32xf32, #tpu.memory_space<vmem>>, vector<16x32xf32>
    %cst_10 = arith.constant dense<0.000000e+00> : vector<16x96xf32>
    %11 = tpu.matmul %10, %0, %cst_10 {dimension_numbers = #tpu.dot_dimension_numbers<[1], [0], [0], [1], [0, 0, 1, 1], [], []>} : vector<16x32xf32>, vector<32x96xf32>, vector<16x96xf32> -> vector<16x96xf32>
    %12 = vector.broadcast %1 : vector<1x96xf32> to vector<16x96xf32>
    %13 = arith.addf %11, %12 : vector<16x96xf32>
    %c0_11 = arith.constant 0 : index
    %c0_12 = arith.constant 0 : index
    %14 = vector.load %arg4[%c0_11, %c0_12] : memref<16x32xf32, #tpu.memory_space<vmem>>, vector<16x32xf32>
    %cst_13 = arith.constant dense<0.000000e+00> : vector<16x96xf32>
    %15 = tpu.matmul %14, %0, %cst_13 {dimension_numbers = #tpu.dot_dimension_numbers<[1], [0], [0], [1], [0, 0, 1, 1], [], []>} : vector<16x32xf32>, vector<32x96xf32>, vector<16x96xf32> -> vector<16x96xf32>
    %16 = vector.broadcast %1 : vector<1x96xf32> to vector<16x96xf32>
    %17 = arith.addf %15, %16 : vector<16x96xf32>
    %18 = vector.extract_strided_slice %5 {offsets = [0, 16], sizes = [16, 8], strides = [1, 1]} : vector<16x96xf32> to vector<16x8xf32>
    %19 = vector.extract_strided_slice %5 {offsets = [0, 48], sizes = [16, 8], strides = [1, 1]} : vector<16x96xf32> to vector<16x8xf32>
    %20 = vector.extract_strided_slice %5 {offsets = [0, 80], sizes = [16, 8], strides = [1, 1]} : vector<16x96xf32> to vector<16x8xf32>
    %21 = vector.extract_strided_slice %9 {offsets = [0, 8], sizes = [16, 8], strides = [1, 1]} : vector<16x96xf32> to vector<16x8xf32>
    %22 = vector.extract_strided_slice %13 {offsets = [0, 40], sizes = [16, 8], strides = [1, 1]} : vector<16x96xf32> to vector<16x8xf32>
    %23 = vector.extract_strided_slice %17 {offsets = [0, 72], sizes = [16, 8], strides = [1, 1]} : vector<16x96xf32> to vector<16x8xf32>
    %24 = vector.extract_strided_slice %5 {offsets = [0, 24], sizes = [16, 8], strides = [1, 1]} : vector<16x96xf32> to vector<16x8xf32>
    %25 = vector.extract_strided_slice %5 {offsets = [0, 56], sizes = [16, 8], strides = [1, 1]} : vector<16x96xf32> to vector<16x8xf32>
    %26 = vector.extract_strided_slice %5 {offsets = [0, 88], sizes = [16, 8], strides = [1, 1]} : vector<16x96xf32> to vector<16x8xf32>
    %27 = vector.extract_strided_slice %5 {offsets = [0, 0], sizes = [16, 8], strides = [1, 1]} : vector<16x96xf32> to vector<16x8xf32>
    %28 = vector.extract_strided_slice %5 {offsets = [0, 32], sizes = [16, 8], strides = [1, 1]} : vector<16x96xf32> to vector<16x8xf32>
    %29 = vector.extract_strided_slice %5 {offsets = [0, 64], sizes = [16, 8], strides = [1, 1]} : vector<16x96xf32> to vector<16x8xf32>
    %30 = tpu.iota {dimensions = array<i32: 0>} : vector<8x8xi32>
    %31 = tpu.iota {dimensions = array<i32: 1>} : vector<8x8xi32>
    %32 = arith.cmpi sge, %30, %31 : vector<8x8xi32>
    %33 = vector.extract_strided_slice %18 {offsets = [0, 0], sizes = [8, 8], strides = [1, 1]} : vector<16x8xf32> to vector<8x8xf32>
    %34 = vector.extract_strided_slice %19 {offsets = [0, 0], sizes = [8, 8], strides = [1, 1]} : vector<16x8xf32> to vector<8x8xf32>
    %35 = vector.extract_strided_slice %20 {offsets = [0, 0], sizes = [8, 8], strides = [1, 1]} : vector<16x8xf32> to vector<8x8xf32>
    %36 = tpu.transpose %34, [1, 0] : vector<8x8xf32> -> vector<8x8xf32>
    %cst_14 = arith.constant dense<0.000000e+00> : vector<8x8xf32>
    %37 = tpu.matmul %33, %36, %cst_14 {dimension_numbers = #tpu.dot_dimension_numbers<[1], [0], [0], [1], [0, 0, 1, 1], [], []>} : vector<8x8xf32>, vector<8x8xf32>, vector<8x8xf32> -> vector<8x8xf32>
    %cst_15 = arith.constant 0.353553385 : f32
    %38 = vector.broadcast %cst_15 : f32 to vector<8x8xf32>
    %39 = arith.mulf %37, %38 : vector<8x8xf32>
    %cst_16 = arith.constant 0xFF800000 : f32
    %40 = vector.broadcast %cst_16 : f32 to vector<8x8xf32>
    %41 = arith.select %32, %39, %40 : vector<8x8xi1>, vector<8x8xf32>
    %cst_17 = arith.constant dense<0xFF800000> : vector<8xf32>
    %42 = vector.multi_reduction <maximumf>, %41, %cst_17 [1] : vector<8x8xf32> to vector<8xf32>
    %43 = vector.shape_cast %42 : vector<8xf32> to vector<8x1xf32>
    %44 = vector.broadcast %43 : vector<8x1xf32> to vector<8x8xf32>
    %45 = arith.subf %41, %44 : vector<8x8xf32>
    %46 = math.exp %45 : vector<8x8xf32>
    %cst_18 = arith.constant dense<0.000000e+00> : vector<8xf32>
    %47 = vector.multi_reduction <add>, %46, %cst_18 [1] : vector<8x8xf32> to vector<8xf32>
    %48 = vector.shape_cast %47 : vector<8xf32> to vector<8x1xf32>
    %cst_19 = arith.constant dense<0.000000e+00> : vector<8x8xf32>
    %49 = tpu.matmul %46, %35, %cst_19 {dimension_numbers = #tpu.dot_dimension_numbers<[1], [0], [0], [1], [0, 0, 1, 1], [], []>} : vector<8x8xf32>, vector<8x8xf32>, vector<8x8xf32> -> vector<8x8xf32>
    %50 = tpu.reciprocal %48 : vector<8x1xf32> -> vector<8x1xf32>
    %51 = vector.broadcast %50 : vector<8x1xf32> to vector<8x8xf32>
    %52 = arith.mulf %49, %51 : vector<8x8xf32>
    %53 = vector.extract_strided_slice %21 {offsets = [0, 0], sizes = [8, 8], strides = [1, 1]} : vector<16x8xf32> to vector<8x8xf32>
    %54 = vector.extract_strided_slice %22 {offsets = [0, 0], sizes = [8, 8], strides = [1, 1]} : vector<16x8xf32> to vector<8x8xf32>
    %55 = vector.extract_strided_slice %23 {offsets = [0, 0], sizes = [8, 8], strides = [1, 1]} : vector<16x8xf32> to vector<8x8xf32>
    %56 = tpu.transpose %54, [1, 0] : vector<8x8xf32> -> vector<8x8xf32>
    %cst_20 = arith.constant dense<0.000000e+00> : vector<8x8xf32>
    %57 = tpu.matmul %53, %56, %cst_20 {dimension_numbers = #tpu.dot_dimension_numbers<[1], [0], [0], [1], [0, 0, 1, 1], [], []>} : vector<8x8xf32>, vector<8x8xf32>, vector<8x8xf32> -> vector<8x8xf32>
    %cst_21 = arith.constant 0.353553385 : f32
    %58 = vector.broadcast %cst_21 : f32 to vector<8x8xf32>
    %59 = arith.mulf %57, %58 : vector<8x8xf32>
    %cst_22 = arith.constant 0xFF800000 : f32
    %60 = vector.broadcast %cst_22 : f32 to vector<8x8xf32>
    %61 = arith.select %32, %59, %60 : vector<8x8xi1>, vector<8x8xf32>
    %cst_23 = arith.constant dense<0xFF800000> : vector<8xf32>
    %62 = vector.multi_reduction <maximumf>, %61, %cst_23 [1] : vector<8x8xf32> to vector<8xf32>
    %63 = vector.shape_cast %62 : vector<8xf32> to vector<8x1xf32>
    %64 = vector.broadcast %63 : vector<8x1xf32> to vector<8x8xf32>
    %65 = arith.subf %61, %64 : vector<8x8xf32>
    %66 = math.exp %65 : vector<8x8xf32>
    %cst_24 = arith.constant dense<0.000000e+00> : vector<8xf32>
    %67 = vector.multi_reduction <add>, %66, %cst_24 [1] : vector<8x8xf32> to vector<8xf32>
    %68 = vector.shape_cast %67 : vector<8xf32> to vector<8x1xf32>
    %cst_25 = arith.constant dense<0.000000e+00> : vector<8x8xf32>
    %69 = tpu.matmul %66, %55, %cst_25 {dimension_numbers = #tpu.dot_dimension_numbers<[1], [0], [0], [1], [0, 0, 1, 1], [], []>} : vector<8x8xf32>, vector<8x8xf32>, vector<8x8xf32> -> vector<8x8xf32>
    %70 = tpu.reciprocal %68 : vector<8x1xf32> -> vector<8x1xf32>
    %71 = vector.broadcast %70 : vector<8x1xf32> to vector<8x8xf32>
    %72 = arith.mulf %69, %71 : vector<8x8xf32>
    %73 = vector.extract_strided_slice %24 {offsets = [0, 0], sizes = [8, 8], strides = [1, 1]} : vector<16x8xf32> to vector<8x8xf32>
    %74 = vector.extract_strided_slice %25 {offsets = [0, 0], sizes = [8, 8], strides = [1, 1]} : vector<16x8xf32> to vector<8x8xf32>
    %75 = vector.extract_strided_slice %26 {offsets = [0, 0], sizes = [8, 8], strides = [1, 1]} : vector<16x8xf32> to vector<8x8xf32>
    %76 = tpu.transpose %74, [1, 0] : vector<8x8xf32> -> vector<8x8xf32>
    %cst_26 = arith.constant dense<0.000000e+00> : vector<8x8xf32>
    %77 = tpu.matmul %73, %76, %cst_26 {dimension_numbers = #tpu.dot_dimension_numbers<[1], [0], [0], [1], [0, 0, 1, 1], [], []>} : vector<8x8xf32>, vector<8x8xf32>, vector<8x8xf32> -> vector<8x8xf32>
    %cst_27 = arith.constant 0.353553385 : f32
    %78 = vector.broadcast %cst_27 : f32 to vector<8x8xf32>
    %79 = arith.mulf %77, %78 : vector<8x8xf32>
    %cst_28 = arith.constant 0xFF800000 : f32
    %80 = vector.broadcast %cst_28 : f32 to vector<8x8xf32>
    %81 = arith.select %32, %79, %80 : vector<8x8xi1>, vector<8x8xf32>
    %cst_29 = arith.constant dense<0xFF800000> : vector<8xf32>
    %82 = vector.multi_reduction <maximumf>, %81, %cst_29 [1] : vector<8x8xf32> to vector<8xf32>
    %83 = vector.shape_cast %82 : vector<8xf32> to vector<8x1xf32>
    %84 = vector.broadcast %83 : vector<8x1xf32> to vector<8x8xf32>
    %85 = arith.subf %81, %84 : vector<8x8xf32>
    %86 = math.exp %85 : vector<8x8xf32>
    %cst_30 = arith.constant dense<0.000000e+00> : vector<8xf32>
    %87 = vector.multi_reduction <add>, %86, %cst_30 [1] : vector<8x8xf32> to vector<8xf32>
    %88 = vector.shape_cast %87 : vector<8xf32> to vector<8x1xf32>
    %cst_31 = arith.constant dense<0.000000e+00> : vector<8x8xf32>
    %89 = tpu.matmul %86, %75, %cst_31 {dimension_numbers = #tpu.dot_dimension_numbers<[1], [0], [0], [1], [0, 0, 1, 1], [], []>} : vector<8x8xf32>, vector<8x8xf32>, vector<8x8xf32> -> vector<8x8xf32>
    %90 = tpu.reciprocal %88 : vector<8x1xf32> -> vector<8x1xf32>
    %91 = vector.broadcast %90 : vector<8x1xf32> to vector<8x8xf32>
    %92 = arith.mulf %89, %91 : vector<8x8xf32>
    %93 = vector.extract_strided_slice %27 {offsets = [0, 0], sizes = [8, 8], strides = [1, 1]} : vector<16x8xf32> to vector<8x8xf32>
    %94 = vector.extract_strided_slice %28 {offsets = [0, 0], sizes = [8, 8], strides = [1, 1]} : vector<16x8xf32> to vector<8x8xf32>
    %95 = vector.extract_strided_slice %29 {offsets = [0, 0], sizes = [8, 8], strides = [1, 1]} : vector<16x8xf32> to vector<8x8xf32>
    %96 = tpu.transpose %94, [1, 0] : vector<8x8xf32> -> vector<8x8xf32>
    %cst_32 = arith.constant dense<0.000000e+00> : vector<8x8xf32>
    %97 = tpu.matmul %93, %96, %cst_32 {dimension_numbers = #tpu.dot_dimension_numbers<[1], [0], [0], [1], [0, 0, 1, 1], [], []>} : vector<8x8xf32>, vector<8x8xf32>, vector<8x8xf32> -> vector<8x8xf32>
    %cst_33 = arith.constant 0.353553385 : f32
    %98 = vector.broadcast %cst_33 : f32 to vector<8x8xf32>
    %99 = arith.mulf %97, %98 : vector<8x8xf32>
    %cst_34 = arith.constant 0xFF800000 : f32
    %100 = vector.broadcast %cst_34 : f32 to vector<8x8xf32>
    %101 = arith.select %32, %99, %100 : vector<8x8xi1>, vector<8x8xf32>
    %cst_35 = arith.constant dense<0xFF800000> : vector<8xf32>
    %102 = vector.multi_reduction <maximumf>, %101, %cst_35 [1] : vector<8x8xf32> to vector<8xf32>
    %103 = vector.shape_cast %102 : vector<8xf32> to vector<8x1xf32>
    %104 = vector.broadcast %103 : vector<8x1xf32> to vector<8x8xf32>
    %105 = arith.subf %101, %104 : vector<8x8xf32>
    %106 = math.exp %105 : vector<8x8xf32>
    %cst_36 = arith.constant dense<0.000000e+00> : vector<8xf32>
    %107 = vector.multi_reduction <add>, %106, %cst_36 [1] : vector<8x8xf32> to vector<8xf32>
    %108 = vector.shape_cast %107 : vector<8xf32> to vector<8x1xf32>
    %cst_37 = arith.constant dense<0.000000e+00> : vector<8x8xf32>
    %109 = tpu.matmul %106, %95, %cst_37 {dimension_numbers = #tpu.dot_dimension_numbers<[1], [0], [0], [1], [0, 0, 1, 1], [], []>} : vector<8x8xf32>, vector<8x8xf32>, vector<8x8xf32> -> vector<8x8xf32>
    %110 = tpu.reciprocal %108 : vector<8x1xf32> -> vector<8x1xf32>
    %111 = vector.broadcast %110 : vector<8x1xf32> to vector<8x8xf32>
    %112 = arith.mulf %109, %111 : vector<8x8xf32>
    %113 = tpu.concatenate %52, %72, %92, %112 in 1 : vector<8x8xf32>, vector<8x8xf32>, vector<8x8xf32>, vector<8x8xf32> -> vector<8x32xf32>
    %114 = vector.extract_strided_slice %18 {offsets = [8, 0], sizes = [8, 8], strides = [1, 1]} : vector<16x8xf32> to vector<8x8xf32>
    %115 = vector.extract_strided_slice %19 {offsets = [8, 0], sizes = [8, 8], strides = [1, 1]} : vector<16x8xf32> to vector<8x8xf32>
    %116 = vector.extract_strided_slice %20 {offsets = [8, 0], sizes = [8, 8], strides = [1, 1]} : vector<16x8xf32> to vector<8x8xf32>
    %117 = tpu.transpose %115, [1, 0] : vector<8x8xf32> -> vector<8x8xf32>
    %cst_38 = arith.constant dense<0.000000e+00> : vector<8x8xf32>
    %118 = tpu.matmul %114, %117, %cst_38 {dimension_numbers = #tpu.dot_dimension_numbers<[1], [0], [0], [1], [0, 0, 1, 1], [], []>} : vector<8x8xf32>, vector<8x8xf32>, vector<8x8xf32> -> vector<8x8xf32>
    %cst_39 = arith.constant 0.353553385 : f32
    %119 = vector.broadcast %cst_39 : f32 to vector<8x8xf32>
    %120 = arith.mulf %118, %119 : vector<8x8xf32>
    %cst_40 = arith.constant 0xFF800000 : f32
    %121 = vector.broadcast %cst_40 : f32 to vector<8x8xf32>
    %122 = arith.select %32, %120, %121 : vector<8x8xi1>, vector<8x8xf32>
    %cst_41 = arith.constant dense<0xFF800000> : vector<8xf32>
    %123 = vector.multi_reduction <maximumf>, %122, %cst_41 [1] : vector<8x8xf32> to vector<8xf32>
    %124 = vector.shape_cast %123 : vector<8xf32> to vector<8x1xf32>
    %125 = vector.broadcast %124 : vector<8x1xf32> to vector<8x8xf32>
    %126 = arith.subf %122, %125 : vector<8x8xf32>
    %127 = math.exp %126 : vector<8x8xf32>
    %cst_42 = arith.constant dense<0.000000e+00> : vector<8xf32>
    %128 = vector.multi_reduction <add>, %127, %cst_42 [1] : vector<8x8xf32> to vector<8xf32>
    %129 = vector.shape_cast %128 : vector<8xf32> to vector<8x1xf32>
    %cst_43 = arith.constant dense<0.000000e+00> : vector<8x8xf32>
    %130 = tpu.matmul %127, %116, %cst_43 {dimension_numbers = #tpu.dot_dimension_numbers<[1], [0], [0], [1], [0, 0, 1, 1], [], []>} : vector<8x8xf32>, vector<8x8xf32>, vector<8x8xf32> -> vector<8x8xf32>
    %131 = tpu.reciprocal %129 : vector<8x1xf32> -> vector<8x1xf32>
    %132 = vector.broadcast %131 : vector<8x1xf32> to vector<8x8xf32>
    %133 = arith.mulf %130, %132 : vector<8x8xf32>
    %134 = vector.extract_strided_slice %21 {offsets = [8, 0], sizes = [8, 8], strides = [1, 1]} : vector<16x8xf32> to vector<8x8xf32>
    %135 = vector.extract_strided_slice %22 {offsets = [8, 0], sizes = [8, 8], strides = [1, 1]} : vector<16x8xf32> to vector<8x8xf32>
    %136 = vector.extract_strided_slice %23 {offsets = [8, 0], sizes = [8, 8], strides = [1, 1]} : vector<16x8xf32> to vector<8x8xf32>
    %137 = tpu.transpose %135, [1, 0] : vector<8x8xf32> -> vector<8x8xf32>
    %cst_44 = arith.constant dense<0.000000e+00> : vector<8x8xf32>
    %138 = tpu.matmul %134, %137, %cst_44 {dimension_numbers = #tpu.dot_dimension_numbers<[1], [0], [0], [1], [0, 0, 1, 1], [], []>} : vector<8x8xf32>, vector<8x8xf32>, vector<8x8xf32> -> vector<8x8xf32>
    %cst_45 = arith.constant 0.353553385 : f32
    %139 = vector.broadcast %cst_45 : f32 to vector<8x8xf32>
    %140 = arith.mulf %138, %139 : vector<8x8xf32>
    %cst_46 = arith.constant 0xFF800000 : f32
    %141 = vector.broadcast %cst_46 : f32 to vector<8x8xf32>
    %142 = arith.select %32, %140, %141 : vector<8x8xi1>, vector<8x8xf32>
    %cst_47 = arith.constant dense<0xFF800000> : vector<8xf32>
    %143 = vector.multi_reduction <maximumf>, %142, %cst_47 [1] : vector<8x8xf32> to vector<8xf32>
    %144 = vector.shape_cast %143 : vector<8xf32> to vector<8x1xf32>
    %145 = vector.broadcast %144 : vector<8x1xf32> to vector<8x8xf32>
    %146 = arith.subf %142, %145 : vector<8x8xf32>
    %147 = math.exp %146 : vector<8x8xf32>
    %cst_48 = arith.constant dense<0.000000e+00> : vector<8xf32>
    %148 = vector.multi_reduction <add>, %147, %cst_48 [1] : vector<8x8xf32> to vector<8xf32>
    %149 = vector.shape_cast %148 : vector<8xf32> to vector<8x1xf32>
    %cst_49 = arith.constant dense<0.000000e+00> : vector<8x8xf32>
    %150 = tpu.matmul %147, %136, %cst_49 {dimension_numbers = #tpu.dot_dimension_numbers<[1], [0], [0], [1], [0, 0, 1, 1], [], []>} : vector<8x8xf32>, vector<8x8xf32>, vector<8x8xf32> -> vector<8x8xf32>
    %151 = tpu.reciprocal %149 : vector<8x1xf32> -> vector<8x1xf32>
    %152 = vector.broadcast %151 : vector<8x1xf32> to vector<8x8xf32>
    %153 = arith.mulf %150, %152 : vector<8x8xf32>
    %154 = vector.extract_strided_slice %24 {offsets = [8, 0], sizes = [8, 8], strides = [1, 1]} : vector<16x8xf32> to vector<8x8xf32>
    %155 = vector.extract_strided_slice %25 {offsets = [8, 0], sizes = [8, 8], strides = [1, 1]} : vector<16x8xf32> to vector<8x8xf32>
    %156 = vector.extract_strided_slice %26 {offsets = [8, 0], sizes = [8, 8], strides = [1, 1]} : vector<16x8xf32> to vector<8x8xf32>
    %157 = tpu.transpose %155, [1, 0] : vector<8x8xf32> -> vector<8x8xf32>
    %cst_50 = arith.constant dense<0.000000e+00> : vector<8x8xf32>
    %158 = tpu.matmul %154, %157, %cst_50 {dimension_numbers = #tpu.dot_dimension_numbers<[1], [0], [0], [1], [0, 0, 1, 1], [], []>} : vector<8x8xf32>, vector<8x8xf32>, vector<8x8xf32> -> vector<8x8xf32>
    %cst_51 = arith.constant 0.353553385 : f32
    %159 = vector.broadcast %cst_51 : f32 to vector<8x8xf32>
    %160 = arith.mulf %158, %159 : vector<8x8xf32>
    %cst_52 = arith.constant 0xFF800000 : f32
    %161 = vector.broadcast %cst_52 : f32 to vector<8x8xf32>
    %162 = arith.select %32, %160, %161 : vector<8x8xi1>, vector<8x8xf32>
    %cst_53 = arith.constant dense<0xFF800000> : vector<8xf32>
    %163 = vector.multi_reduction <maximumf>, %162, %cst_53 [1] : vector<8x8xf32> to vector<8xf32>
    %164 = vector.shape_cast %163 : vector<8xf32> to vector<8x1xf32>
    %165 = vector.broadcast %164 : vector<8x1xf32> to vector<8x8xf32>
    %166 = arith.subf %162, %165 : vector<8x8xf32>
    %167 = math.exp %166 : vector<8x8xf32>
    %cst_54 = arith.constant dense<0.000000e+00> : vector<8xf32>
    %168 = vector.multi_reduction <add>, %167, %cst_54 [1] : vector<8x8xf32> to vector<8xf32>
    %169 = vector.shape_cast %168 : vector<8xf32> to vector<8x1xf32>
    %cst_55 = arith.constant dense<0.000000e+00> : vector<8x8xf32>
    %170 = tpu.matmul %167, %156, %cst_55 {dimension_numbers = #tpu.dot_dimension_numbers<[1], [0], [0], [1], [0, 0, 1, 1], [], []>} : vector<8x8xf32>, vector<8x8xf32>, vector<8x8xf32> -> vector<8x8xf32>
    %171 = tpu.reciprocal %169 : vector<8x1xf32> -> vector<8x1xf32>
    %172 = vector.broadcast %171 : vector<8x1xf32> to vector<8x8xf32>
    %173 = arith.mulf %170, %172 : vector<8x8xf32>
    %174 = vector.extract_strided_slice %27 {offsets = [8, 0], sizes = [8, 8], strides = [1, 1]} : vector<16x8xf32> to vector<8x8xf32>
    %175 = vector.extract_strided_slice %28 {offsets = [8, 0], sizes = [8, 8], strides = [1, 1]} : vector<16x8xf32> to vector<8x8xf32>
    %176 = vector.extract_strided_slice %29 {offsets = [8, 0], sizes = [8, 8], strides = [1, 1]} : vector<16x8xf32> to vector<8x8xf32>
    %177 = tpu.transpose %175, [1, 0] : vector<8x8xf32> -> vector<8x8xf32>
    %cst_56 = arith.constant dense<0.000000e+00> : vector<8x8xf32>
    %178 = tpu.matmul %174, %177, %cst_56 {dimension_numbers = #tpu.dot_dimension_numbers<[1], [0], [0], [1], [0, 0, 1, 1], [], []>} : vector<8x8xf32>, vector<8x8xf32>, vector<8x8xf32> -> vector<8x8xf32>
    %cst_57 = arith.constant 0.353553385 : f32
    %179 = vector.broadcast %cst_57 : f32 to vector<8x8xf32>
    %180 = arith.mulf %178, %179 : vector<8x8xf32>
    %cst_58 = arith.constant 0xFF800000 : f32
    %181 = vector.broadcast %cst_58 : f32 to vector<8x8xf32>
    %182 = arith.select %32, %180, %181 : vector<8x8xi1>, vector<8x8xf32>
    %cst_59 = arith.constant dense<0xFF800000> : vector<8xf32>
    %183 = vector.multi_reduction <maximumf>, %182, %cst_59 [1] : vector<8x8xf32> to vector<8xf32>
    %184 = vector.shape_cast %183 : vector<8xf32> to vector<8x1xf32>
    %185 = vector.broadcast %184 : vector<8x1xf32> to vector<8x8xf32>
    %186 = arith.subf %182, %185 : vector<8x8xf32>
    %187 = math.exp %186 : vector<8x8xf32>
    %cst_60 = arith.constant dense<0.000000e+00> : vector<8xf32>
    %188 = vector.multi_reduction <add>, %187, %cst_60 [1] : vector<8x8xf32> to vector<8xf32>
    %189 = vector.shape_cast %188 : vector<8xf32> to vector<8x1xf32>
    %cst_61 = arith.constant dense<0.000000e+00> : vector<8x8xf32>
    %190 = tpu.matmul %187, %176, %cst_61 {dimension_numbers = #tpu.dot_dimension_numbers<[1], [0], [0], [1], [0, 0, 1, 1], [], []>} : vector<8x8xf32>, vector<8x8xf32>, vector<8x8xf32> -> vector<8x8xf32>
    %191 = tpu.reciprocal %189 : vector<8x1xf32> -> vector<8x1xf32>
    %192 = vector.broadcast %191 : vector<8x1xf32> to vector<8x8xf32>
    %193 = arith.mulf %190, %192 : vector<8x8xf32>
    %194 = tpu.concatenate %133, %153, %173, %193 in 1 : vector<8x8xf32>, vector<8x8xf32>, vector<8x8xf32>, vector<8x8xf32> -> vector<8x32xf32>
    %195 = tpu.concatenate %113, %194 in 0 : vector<8x32xf32>, vector<8x32xf32> -> vector<16x32xf32>
    %c0_62 = arith.constant 0 : index
    %c0_63 = arith.constant 0 : index
    %196 = vector.load %arg1[%c0_62, %c0_63] : memref<16x32xf32, #tpu.memory_space<vmem>>, vector<16x32xf32>
    %c0_64 = arith.constant 0 : index
    %c0_65 = arith.constant 0 : index
    %197 = vector.load %arg8[%c0_64, %c0_65] : memref<32x32xf32, #tpu.memory_space<vmem>>, vector<32x32xf32>
    %cst_66 = arith.constant dense<0.000000e+00> : vector<16x32xf32>
    %198 = tpu.matmul %195, %197, %cst_66 {dimension_numbers = #tpu.dot_dimension_numbers<[1], [0], [0], [1], [0, 0, 1, 1], [], []>} : vector<16x32xf32>, vector<32x32xf32>, vector<16x32xf32> -> vector<16x32xf32>
    %199 = arith.addf %196, %198 : vector<16x32xf32>
    %c0_67 = arith.constant 0 : index
    %c0_68 = arith.constant 0 : index
    %200 = vector.load %arg9[%c0_67, %c0_68] : memref<1x32xf32, #tpu.memory_space<vmem>>, vector<1x32xf32>
    %201 = vector.broadcast %200 : vector<1x32xf32> to vector<16x32xf32>
    %202 = arith.addf %199, %201 : vector<16x32xf32>
    %cst_69 = arith.constant dense<0.000000e+00> : vector<16xf32>
    %203 = vector.multi_reduction <add>, %202, %cst_69 [1] : vector<16x32xf32> to vector<16xf32>
    %204 = vector.shape_cast %203 : vector<16xf32> to vector<16x1xf32>
    %cst_70 = arith.constant 3.200000e+01 : f32
    %205 = vector.broadcast %cst_70 : f32 to vector<16x1xf32>
    %206 = arith.divf %204, %205 : vector<16x1xf32>
    %207 = vector.broadcast %206 : vector<16x1xf32> to vector<16x32xf32>
    %208 = arith.subf %202, %207 : vector<16x32xf32>
    %209 = arith.mulf %208, %208 : vector<16x32xf32>
    %cst_71 = arith.constant dense<0.000000e+00> : vector<16xf32>
    %210 = vector.multi_reduction <add>, %209, %cst_71 [1] : vector<16x32xf32> to vector<16xf32>
    %211 = vector.shape_cast %210 : vector<16xf32> to vector<16x1xf32>
    %cst_72 = arith.constant 3.200000e+01 : f32
    %212 = vector.broadcast %cst_72 : f32 to vector<16x1xf32>
    %213 = arith.divf %211, %212 : vector<16x1xf32>
    %214 = vector.broadcast %206 : vector<16x1xf32> to vector<16x32xf32>
    %215 = arith.subf %202, %214 : vector<16x32xf32>
    %cst_73 = arith.constant 9.99999974E-6 : f32
    %216 = vector.broadcast %cst_73 : f32 to vector<16x1xf32>
    %217 = arith.addf %213, %216 : vector<16x1xf32>
    %218 = math.rsqrt %217 : vector<16x1xf32>
    %219 = vector.broadcast %218 : vector<16x1xf32> to vector<16x32xf32>
    %220 = arith.mulf %215, %219 : vector<16x32xf32>
    %c0_74 = arith.constant 0 : index
    %c0_75 = arith.constant 0 : index
    %221 = vector.load %arg10[%c0_74, %c0_75] : memref<1x32xf32, #tpu.memory_space<vmem>>, vector<1x32xf32>
    %222 = vector.broadcast %221 : vector<1x32xf32> to vector<16x32xf32>
    %223 = arith.mulf %220, %222 : vector<16x32xf32>
    %c0_76 = arith.constant 0 : index
    %c0_77 = arith.constant 0 : index
    %224 = vector.load %arg11[%c0_76, %c0_77] : memref<1x32xf32, #tpu.memory_space<vmem>>, vector<1x32xf32>
    %225 = vector.broadcast %224 : vector<1x32xf32> to vector<16x32xf32>
    %226 = arith.addf %223, %225 : vector<16x32xf32>
    %c0_78 = arith.constant 0 : index
    %c0_79 = arith.constant 0 : index
    %227 = vector.load %arg12[%c0_78, %c0_79] : memref<32x128xf32, #tpu.memory_space<vmem>>, vector<32x128xf32>
    %cst_80 = arith.constant dense<0.000000e+00> : vector<16x128xf32>
    %228 = tpu.matmul %226, %227, %cst_80 {dimension_numbers = #tpu.dot_dimension_numbers<[1], [0], [0], [1], [0, 0, 1, 1], [], []>} : vector<16x32xf32>, vector<32x128xf32>, vector<16x128xf32> -> vector<16x128xf32>
    %c0_81 = arith.constant 0 : index
    %c0_82 = arith.constant 0 : index
    %229 = vector.load %arg13[%c0_81, %c0_82] : memref<1x128xf32, #tpu.memory_space<vmem>>, vector<1x128xf32>
    %230 = vector.broadcast %229 : vector<1x128xf32> to vector<16x128xf32>
    %231 = arith.addf %228, %230 : vector<16x128xf32>
    %cst_83 = arith.constant 5.000000e-01 : f32
    %232 = vector.broadcast %cst_83 : f32 to vector<16x128xf32>
    %233 = arith.mulf %232, %231 : vector<16x128xf32>
    %cst_84 = arith.constant 0.707106769 : f32
    %234 = vector.broadcast %cst_84 : f32 to vector<16x128xf32>
    %235 = arith.mulf %231, %234 : vector<16x128xf32>
    %236 = math.erf %235 : vector<16x128xf32>
    %cst_85 = arith.constant 1.000000e+00 : f32
    %237 = vector.broadcast %cst_85 : f32 to vector<16x128xf32>
    %238 = arith.addf %237, %236 : vector<16x128xf32>
    %239 = arith.mulf %233, %238 : vector<16x128xf32>
    %c0_86 = arith.constant 0 : index
    %c0_87 = arith.constant 0 : index
    %240 = vector.load %arg14[%c0_86, %c0_87] : memref<128x32xf32, #tpu.memory_space<vmem>>, vector<128x32xf32>
    %cst_88 = arith.constant dense<0.000000e+00> : vector<16x32xf32>
    %241 = tpu.matmul %239, %240, %cst_88 {dimension_numbers = #tpu.dot_dimension_numbers<[1], [0], [0], [1], [0, 0, 1, 1], [], []>} : vector<16x128xf32>, vector<128x32xf32>, vector<16x32xf32> -> vector<16x32xf32>
    %c0_89 = arith.constant 0 : index
    %c0_90 = arith.constant 0 : index
    %242 = vector.load %arg15[%c0_89, %c0_90] : memref<1x32xf32, #tpu.memory_space<vmem>>, vector<1x32xf32>
    %243 = vector.broadcast %242 : vector<1x32xf32> to vector<16x32xf32>
    %244 = arith.addf %241, %243 : vector<16x32xf32>
    %245 = arith.addf %202, %244 : vector<16x32xf32>
    %c0_91 = arith.constant 0 : index
    %c0_92 = arith.constant 0 : index
    %246 = vector.load %arg16[%c0_91, %c0_92] : memref<16x32xf32, #tpu.memory_space<vmem>>, vector<16x32xf32>
    tpu.vector_store %arg16[%c0_91, %c0_92], %245 {strides = array<i32>} : memref<16x32xf32, #tpu.memory_space<vmem>>, vector<16x32xf32>,
    return
  }
  func.func @transform_0(%arg0: i32) -> (i32, i32) {
    %c0_i32 = arith.constant 0 : i32
    %c0_i32_0 = arith.constant 0 : i32
    %c0_i32_1 = arith.constant 0 : i32
    return %c0_i32, %c0_i32_0 : i32, i32
  }
  func.func @transform_1(%arg0: i32) -> (i32, i32) {
    %c0_i32 = arith.constant 0 : i32
    %c0_i32_0 = arith.constant 0 : i32
    %c0_i32_1 = arith.constant 0 : i32
    return %c0_i32, %c0_i32_0 : i32, i32
  }
  func.func @transform_2(%arg0: i32) -> (i32, i32) {
    %c0_i32 = arith.constant 0 : i32
    %c0_i32_0 = arith.constant 0 : i32
    %c0_i32_1 = arith.constant 0 : i32
    return %c0_i32, %c0_i32_0 : i32, i32
  }
  func.func @transform_3(%arg0: i32) -> (i32, i32) {
    %c0_i32 = arith.constant 0 : i32
    %c0_i32_0 = arith.constant 0 : i32
    %c0_i32_1 = arith.constant 0 : i32
    return %c0_i32, %c0_i32_0 : i32, i32
  }
  func.func @transform_4(%arg0: i32) -> (i32, i32) {
    %c0_i32 = arith.constant 0 : i32
    %c0_i32_0 = arith.constant 0 : i32
    %c0_i32_1 = arith.constant 0 : i32
    return %c0_i32, %c0_i32_0 : i32, i32
  }
  func.func @transform_5(%arg0: i32) -> (i32, i32) {
    %c0_i32 = arith.constant 0 : i32
    %c0_i32_0 = arith.constant 0 : i32
    %c0_i32_1 = arith.constant 0 : i32
    return %c0_i32, %c0_i32_0 : i32, i32
  }
  func.func @transform_6(%arg0: i32) -> (i32, i32) {
    %c0_i32 = arith.constant 0 : i32
    %c0_i32_0 = arith.constant 0 : i32
    %c0_i32_1 = arith.constant 0 : i32
    return %c0_i32, %c0_i32_0 : i32, i32
  }
  func.func @transform_7(%arg0: i32) -> (i32, i32) {
    %c0_i32 = arith.constant 0 : i32
    %c0_i32_0 = arith.constant 0 : i32
    %c0_i32_1 = arith.constant 0 : i32
    return %c0_i32, %c0_i32_0 : i32, i32
  }
  func.func @transform_8(%arg0: i32) -> (i32, i32) {
    %c0_i32 = arith.constant 0 : i32
    %c0_i32_0 = arith.constant 0 : i32
    %c0_i32_1 = arith.constant 0 : i32
    return %c0_i32, %c0_i32_0 : i32, i32
  }
  func.func @transform_9(%arg0: i32) -> (i32, i32) {
    %c0_i32 = arith.constant 0 : i32
    %c0_i32_0 = arith.constant 0 : i32
    %c0_i32_1 = arith.constant 0 : i32
    return %c0_i32, %c0_i32_0 : i32, i32
  }
  func.func @transform_10(%arg0: i32) -> (i32, i32) {
    %c0_i32 = arith.constant 0 : i32
    %c0_i32_0 = arith.constant 0 : i32
    %c0_i32_1 = arith.constant 0 : i32
    return %c0_i32, %c0_i32_0 : i32, i32
  }
  func.func @transform_11(%arg0: i32) -> (i32, i32) {
    %c0_i32 = arith.constant 0 : i32
    %c0_i32_0 = arith.constant 0 : i32
    %c0_i32_1 = arith.constant 0 : i32
    return %c0_i32, %c0_i32_0 : i32, i32
  }
  func.func @transform_12(%arg0: i32) -> (i32, i32) {
    %c0_i32 = arith.constant 0 : i32
    %c0_i32_0 = arith.constant 0 : i32
    %c0_i32_1 = arith.constant 0 : i32
    return %c0_i32, %c0_i32_0 : i32, i32
  }
  func.func @transform_13(%arg0: i32) -> (i32, i32) {
    %c0_i32 = arith.constant 0 : i32
    %c0_i32_0 = arith.constant 0 : i32
    %c0_i32_1 = arith.constant 0 : i32
    return %c0_i32, %c0_i32_0 : i32, i32
  }
  func.func @transform_14(%arg0: i32) -> (i32, i32) {
    %c0_i32 = arith.constant 0 : i32
    %c0_i32_0 = arith.constant 0 : i32
    %c0_i32_1 = arith.constant 0 : i32
    return %c0_i32, %c0_i32_0 : i32, i32
  }
  func.func @transform_15(%arg0: i32) -> (i32, i32) {
    %c0_i32 = arith.constant 0 : i32
    %c0_i32_0 = arith.constant 0 : i32
    %c0_i32_1 = arith.constant 0 : i32
    return %c0_i32, %c0_i32_0 : i32, i32
  }
}

</mosaic_0001>

<bundles_post_ra>
// kernel: tpu_custom_call.1
= control target key start
LH: loop header
LB: loop body
LE: loop exit
PB: predicated region body
PF: predicated region fallthrough
CT: control target
= control target key end

     0   :  { %20 = vsyncpa [#allocation3], 0  ;;  %s1753_s0 = inlined_call_operand.vmem [shape: f32[16,32], index: 0, kind: input, shape index: {}]   ;;  %s1754_s1 = inlined_call_operand.vmem [shape: f32[16,32], index: 1, kind: input, shape index: {}]   ;;  %s1755_s2 = inlined_call_operand.vmem [shape: f32[16,32], index: 2, kind: input, shape index: {}]   ;;  %s1756_s3 = inlined_call_operand.vmem [shape: f32[16,32], index: 3, kind: input, shape index: {}]   ;;  %s1757_s4 = inlined_call_operand.hbm [shape: f32[16,32], index: 4, kind: input, shape index: {}]   ;;  %s1758_s5 = inlined_call_operand.vmem [shape: f32[32,96], index: 5, kind: input, shape index: {}]   ;;  %s1759_s6 = inlined_call_operand.vmem [shape: f32[1,96], index: 6, kind: input, shape index: {}]   ;;  %s1760_s7 = inlined_call_operand.vmem [shape: f32[32,32], index: 7, kind: input, shape index: {}]   ;;  %s1761_s8 = inlined_call_operand.vmem [shape: f32[1,32], index: 8, kind: input, shape index: {}]   ;;  %s1762_s9 = inlined_call_operand.vmem [shape: f32[1,32], index: 9, kind: input, shape index: {}]   ;;  %s1763_s10 = inlined_call_operand.vmem [shape: f32[1,32], index: 10, kind: input, shape index: {}]   ;;  %s1764_s11 = inlined_call_operand.vmem [shape: f32[32,128], index: 11, kind: input, shape index: {}]   ;;  %s1765_s12 = inlined_call_operand.vmem [shape: f32[1,128], index: 12, kind: input, shape index: {}]   ;;  %s1766_s13 = inlined_call_operand.vmem [shape: f32[128,32], index: 13, kind: input, shape index: {}]   ;;  %s1767_s14 = inlined_call_operand.vmem [shape: f32[1,32], index: 14, kind: input, shape index: {}]   ;;  %s1768_s15 = inlined_call_operand.hbm [shape: f32[16,32], index: 15, kind: output, shape index: {}]  }
   0x1   :  { %21 = vsyncpa [#allocation4], 0  ;;  %s34_s20 = sshll.u32 %s1757_s4, 4  ;;  %s1340_s21 = smov [#allocation2]   ;;  %s35_s20 = int_to_ptr.hbm [resolvable:$true] %s34_s20 }
   0x2   :  { %s36_s22 = sshll.u32 %s1340_s21, 4  ;;  %s1341_s23 = smov 128   ;;  %s37_s22 = int_to_ptr.vmem [resolvable:$true] %s36_s22 }
   0x3   :  { %s1342_s24 = smov 8  }
   0x4   :  { %42 = dma.hbm_to_vmem [thread:$0]  %s35_s20, 256, %s37_s22, [#allocation3], %s1341_s23, %s1341_s23, %s1342_s24  }
   0x5   :  { %1336 = dma.done.wait [#allocation3], 256  }
   0x6   :  { %1337 = vsyncadd [#allocation3], 4294967040  ;;  %v70_v0 = vld [vmem:[%s1758_s5 + $0x18] sm:$0xff]  ;;  %v69_v1 = vld [vmem:[%s1758_s5 + $0x10] sm:$0xff]  ;;  %vm77_vm0 = vcmask 261120   ;;  %s1345_s28 = smov 88   ;;  %v200_v44 = vlaneseq }
   0x7   :  { %96 = vmatpush.msra.mxu0 %v70_v0  ;;  %158 = vmatpush.msra.mxu3 %v70_v0  ;;  %v68_v2 = vld [vmem:[%s1758_s5 + $0x8] sm:$0xff]  ;;  %v67_v3 = vld [vmem:[%s1758_s5] sm:$0xff]  ;;  %s1346_s29 = smov 80   ;;  %s1347_s17 = smov 120   ;;  %vm210_vm1 = vcmask 64512  }
   0x8   :  { %127 = vmatpush.msra.mxu1 %v70_v0  ;;  %v72_v4 = vld [vmem:[#allocation2] sm:$0xff]  ;;  %v139_v7 = vld [vmem:[%s1755_s2 + $0x8] sm:$0xff]  ;;  %s1348_s18 = smov 72   ;;  %s1349_s19 = smov 104   ;;  %v201_v45 = vshrl.u32 %v200_v44, 7  ;;  %v203_v46 = vand.u32 127, %v200_v44 }
   0x9   :  { %97 = vmatpush.msra.mxu0 %v69_v1  ;;  %159 = vmatpush.msra.mxu3 %v69_v1  ;;  %v138_v5 = vld [vmem:[%s1755_s2] sm:$0xff]  ;;  %v73_v8 = vld [vmem:[#allocation2 + $0x8] sm:$0xff]  ;;  %s1343_s2 = smov 96   ;;  %s1351_s20 = smov 64  }
   0xa   :  { %128 = vmatpush.msra.mxu1 %v69_v1  ;;  %v107_v6 = vld [vmem:[%s1754_s1] sm:$0xff]  ;;  %v108_v9 = vld [vmem:[%s1754_s1 + $0x8] sm:$0xff]  ;;  %s1344_s1 = smov 112   ;;  %vm1529_vm2 = vcmp.ge.s32.totalorder %v201_v45, %v203_v46  ;;  %s1352_s5 = smov 40  }
   0xb   :  { %98 = vmatpush.msra.mxu0 %v68_v2  ;;  %160 = vmatpush.msra.mxu3 %v68_v2  ;;  %v1477_v10 = vld [vmem:[%s1759_s6] ss:$0 sm:$0xff]  ;;  %v170_v22 = vld [vmem:[%s1756_s3 + $0x8] sm:$0xff]  ;;  %s1353_s21 = smov 48   ;;  %s1354_s22 = smov 24  }
   0xc   :  { %129 = vmatpush.msra.mxu1 %v68_v2  ;;  %v169_v16 = vld [vmem:[%s1756_s3] sm:$0xff]  ;;  %s1350_s3 = smov 56   ;;  %s1355_s25 = smov 16  }
   0xd   :  { %99 = vmatpush.msra.mxu0 %v67_v3  ;;  %161 = vmatpush.msra.mxu3 %v67_v3  ;;  %s1357_s16 = smov [#allocation5]  }
   0xe   :  { %1179 = vmatmul.msk.f32.vlgmr.msra.gmra.mxu0 %vm77_vm0, %v72_v4  ;;  %1183 = vmatmul.msk.f32.vlgmr.msra.gmra.mxu3 %vm77_vm0, %v138_v5 }
   0xf   :  { %130 = vmatpush.msra.mxu1 %v67_v3  ;;  %189 = vmatpush.msrb.mxu3 %v70_v0 }
  0x10   :  { %1181 = vmatmul.msk.f32.vlgmr.msra.gmra.mxu1 %vm77_vm0, %v107_v6 }
  0x11   :  { %190 = vmatpush.msrb.mxu3 %v69_v1 }
  0x13   :  { %191 = vmatpush.msrb.mxu3 %v68_v2 }
  0x15   :  { %192 = vmatpush.msrb.mxu3 %v67_v3 }
  0x16   :  { %1184 = vmatmul.msk.f32.gmra.mxu3 %vm77_vm0, %v139_v7  ;;  %1180 = vmatmul.msk.f32.gmra.mxu0 %vm77_vm0, %v73_v8 }
  0x18   :  { %1182 = vmatmul.msk.f32.gmra.mxu1 %vm77_vm0, %v108_v9 }
  0x1e   :  { %1185 = vmatmul.msk.f32.vlgmr.msrb.gmra.mxu3 %vm77_vm0, %v169_v16 }
  0x26   :  { %1186 = vmatmul.msk.f32.gmra.mxu3 %vm77_vm0, %v170_v22 }
  0x8b   :  { %v101_v11 = vpop.f32.mrf.mxu0 }
  0x8c   :  { %v1480_v12 = vadd.f32 %v1477_v10, %v101_v11 }
  0x8d   :  { %v132_v13 = vpop.f32.mrf.mxu1 }
  0x8e   :  { %450 = vrot.lane.b32.xlu1 %v1480_v12, %s1343_s2  ;;  %206 = vrot.lane.b32.xlu2 %v1480_v12, %s1344_s1  ;;  %v133_v18 = vadd.f32 %v1477_v10, %v132_v13 }
  0x91   :  { %v163_v14 = vpop.f32.mrf.mxu3 }
  0x92   :  { %v164_v15 = vadd.f32 %v1477_v10, %v163_v14 }
  0x93   :  { %v104_v23 = vpop.f32.mrf.mxu0 }
  0x94   :  { %291 = vrot.lane.b32.xlu0 %v164_v15, %s1345_s28  ;;  %v1499_v24 = vadd.f32 %v1477_v10, %v104_v23 }
  0x95   :  { %v135_v17 = vpop.f32.mrf.mxu1 }
  0x96   :  { %208 = vrot.lane.b32.xlu1 %v1480_v12, %s1346_s29  ;;  %v136_v21 = vadd.f32 %v1477_v10, %v135_v17 }
  0x99   :  { %v166_v19 = vpop.f32.mrf.mxu3 }
  0x9a   :  { %v167_v20 = vadd.f32 %v1477_v10, %v166_v19 }
  0x9c   :  { %288 = vrot.lane.b32.xlu0 %v133_v18, %s1347_s17  ;;  %630 = vrot.lane.b32.xlu2 %v167_v20, %s1345_s28 }
  0x9e   :  { %627 = vrot.lane.b32.xlu1 %v136_v21, %s1347_s17  ;;  %s1164_s17 = sshll.u32 %s1357_s16, 4  ;;  %s1165_s17 = int_to_ptr.vmem [resolvable:$true] %s1164_s17 }
  0xa1   :  { %v194_v35 = vpop.f32.mrf.mxu3 }
  0xa2   :  { %v195_v38 = vadd.f32 %v1477_v10, %v194_v35 }
  0xa4   :  { %372 = vrot.lane.b32.xlu0 %v1480_v12, %s1348_s18  ;;  %370 = vrot.lane.b32.xlu2 %v1480_v12, %s1349_s19 }
  0xa6   :  { %548 = vrot.lane.b32.xlu1 %v1499_v24, %s1346_s29 }
  0xa9   :  { %v197_v39 = vpop.f32.mrf.mxu3 }
  0xaa   :  { %v198_v40 = vadd.f32 %v1477_v10, %v197_v39 }
  0xac   :  { %789 = vrot.lane.b32.xlu0 %v1499_v24, %s1343_s2  ;;  %546 = vrot.lane.b32.xlu2 %v1499_v24, %s1344_s1  ;;  %v1235_v41 = vpack.i.bf16 %v198_v40, %v195_v38 }
  0xae   :  { %709 = vrot.lane.b32.xlu1 %v1499_v24, %s1349_s19 }
  0xb4   :  { %711 = vrot.lane.b32.xlu0 %v1499_v24, %s1348_s18  ;;  %1236 = vrot.lane.b32.xlu2 %v1235_v41, %s1350_s3 }
  0xe8   :  { %v207_v26 = vpop.permute.xlu2 %206 }
  0xf6   :  { %v631_v29 = vpop.permute.xlu2 %630 }
  0xfe   :  { %v371_v33 = vpop.permute.xlu2 %370 }
 0x100   :  { %v451_v25 = vpop.permute.xlu1 %450 }
 0x106   :  { %v292_v27 = vpop.permute.xlu0 %291  ;;  %v547_v37 = vpop.permute.xlu2 %546 }
 0x107   :  { %1190 = vmatpush.xpose.msk.msra.mxu2 %vm210_vm1, %v292_v27 }
 0x108   :  { %v209_v28 = vpop.permute.xlu1 %208 }
 0x109   :  { %1187 = vmatpush.xpose.msk.msrb.mxu0 %vm210_vm1, %v209_v28 }
 0x10b   :  { %1196 = vmatpush.xpose.msk.msrb.mxu2 %vm210_vm1, %v451_v25 }
 0x10c   :  { %1188 = vmatmul.msk.f32.vlgmr.msrb.gmra.mxu0 %vm210_vm1, %v207_v26 }
 0x10e   :  { %v289_v30 = vpop.permute.xlu0 %288  ;;  %v1237_v13 = vpop.permute.xlu2 %1236 }
 0x10f   :  { %1191 = vmatmul.msk.f32.vlgmr.msra.gmra.mxu2 %vm210_vm1, %v289_v30  ;;  %v1238_v14 = vunpack.i.l.bf16 %v1237_v13 }
 0x110   :  { %v628_v31 = vpop.permute.xlu1 %627  ;;  %1202 = vmatpush.xpose.msk.msra.mxu2 %vm210_vm1, %v631_v29  ;;  %v1239_v29 = vunpack.i.h.bf16 %v1237_v13 }
 0x111   :  { %350 = vmatpush.msra.mxu3 %v1238_v14 }
 0x116   :  { %v373_v32 = vpop.permute.xlu0 %372 }
 0x117   :  { %1193 = vmatpush.xpose.msk.msra.mxu0 %vm210_vm1, %v373_v32  ;;  %1197 = vmatmul.msk.f32.vlgmr.msrb.gmra.mxu2 %vm210_vm1, %v1480_v12 }
 0x118   :  { %v549_v34 = vpop.permute.xlu1 %548 }
 0x11a   :  { %1194 = vmatmul.msk.f32.vlgmr.msra.gmra.mxu0 %vm210_vm1, %v371_v33 }
 0x11b   :  { %1199 = vmatpush.xpose.msk.msrb.mxu0 %vm210_vm1, %v549_v34 }
 0x11e   :  { %v790_v36 = vpop.permute.xlu0 %789 }
 0x11f   :  { %1203 = vmatmul.msk.f32.vlgmr.msra.gmra.mxu2 %vm210_vm1, %v628_v31 }
 0x120   :  { %1208 = vmatpush.xpose.msk.msrb.mxu2 %vm210_vm1, %v790_v36  ;;  %v710_v43 = vpop.permute.xlu1 %709 }
 0x122   :  { %1200 = vmatmul.msk.f32.vlgmr.msrb.gmra.mxu0 %vm210_vm1, %v547_v37 }
 0x126   :  { %v712_v42 = vpop.permute.xlu0 %711 }
 0x127   :  { %1209 = vmatmul.msk.f32.vlgmr.msrb.gmra.mxu2 %vm210_vm1, %v1499_v24  ;;  %1205 = vmatpush.xpose.msk.msra.mxu0 %vm210_vm1, %v712_v42 }
 0x12a   :  { %1206 = vmatmul.msk.f32.vlgmr.msra.gmra.mxu0 %vm210_vm1, %v710_v43 }
 0x189   :  { %v232_v47 = vpop.f32.mrf.mxu0 }
 0x18a   :  { %v235_v49 = vmul.f32 0.35355338, %v232_v47 }
 0x18c   :  { %v1535_v50 = vsel %vm1529_vm2, %v235_v49, -inf }
 0x18d   :  { %v237_v51 = vsel %vm210_vm1, %v1535_v50, -inf }
 0x18e   :  { %238 = vmax.xlane.f32.xlu0 %v237_v51 }
 0x192   :  { %v314_v52 = vpop.f32.mrf.mxu2 }
 0x193   :  { %v317_v53 = vmul.f32 0.35355338, %v314_v52 }
 0x195   :  { %v318_v54 = vsel %vm1529_vm2, %v317_v53, -inf }
 0x196   :  { %v319_v55 = vsel %vm210_vm1, %v318_v54, -inf }
 0x197   :  { %320 = vmax.xlane.f32.xlu2 %v319_v55  ;;  %v395_v56 = vpop.f32.mrf.mxu0 }
 0x198   :  { %v398_v57 = vmul.f32 0.35355338, %v395_v56 }
 0x19a   :  { %v473_v58 = vpop.f32.mrf.mxu2  ;;  %v399_v59 = vsel %vm1529_vm2, %v398_v57, -inf }
 0x19b   :  { %v476_v60 = vmul.f32 0.35355338, %v473_v58  ;;  %v400_v61 = vsel %vm210_vm1, %v399_v59, -inf }
 0x19c   :  { %401 = vmax.xlane.f32.xlu0 %v400_v61 }
 0x19d   :  { %v477_v62 = vsel %vm1529_vm2, %v476_v60, -inf }
 0x19e   :  { %v478_v63 = vsel %vm210_vm1, %v477_v62, -inf }
 0x19f   :  { %479 = vmax.xlane.f32.xlu1 %v478_v63  ;;  %v571_v0 = vpop.f32.mrf.mxu0 }
 0x1a0   :  { %v574_v1 = vmul.f32 0.35355338, %v571_v0 }
 0x1a2   :  { %v653_v2 = vpop.f32.mrf.mxu2  ;;  %v575_v3 = vsel %vm1529_vm2, %v574_v1, -inf }
 0x1a3   :  { %v656_v4 = vmul.f32 0.35355338, %v653_v2  ;;  %v576_v5 = vsel %vm210_vm1, %v575_v3, -inf }
 0x1a4   :  { %577 = vmax.xlane.f32.xlu0 %v576_v5 }
 0x1a5   :  { %v1553_v6 = vsel %vm1529_vm2, %v656_v4, -inf }
 0x1a6   :  { %v658_v7 = vsel %vm210_vm1, %v1553_v6, -inf }
 0x1a7   :  { %v734_v15 = vpop.f32.mrf.mxu0 }
 0x1a8   :  { %v737_v16 = vmul.f32 0.35355338, %v734_v15 }
 0x1aa   :  { %v812_v8 = vpop.f32.mrf.mxu2  ;;  %v1571_v17 = vsel %vm1529_vm2, %v737_v16, -inf }
 0x1ab   :  { %v815_v9 = vmul.f32 0.35355338, %v812_v8  ;;  %v739_v18 = vsel %vm210_vm1, %v1571_v17, -inf }
 0x1ac   :  { %659 = vmax.xlane.f32.xlu0 %v658_v7 }
 0x1ad   :  { %v1560_v10 = vsel %vm1529_vm2, %v815_v9, -inf }
 0x1ae   :  { %v817_v11 = vsel %vm210_vm1, %v1560_v10, -inf }
 0x1af   :  { %487 = vrot.lane.b32.xlu2 %v1480_v12, %s1351_s20 }
 0x1b4   :  { %818 = vmax.xlane.f32.xlu0 %v817_v11 }
 0x1b7   :  { %409 = vrot.lane.b32.xlu2 %v1480_v12, %s1352_s5 }
 0x1b8   :  { %246 = vrot.lane.b32.xlu1 %v1480_v12, %s1353_s21 }
 0x1bf   :  { %585 = vrot.lane.b32.xlu2 %v1499_v24, %s1353_s21 }
 0x1c7   :  { %748 = vrot.lane.b32.xlu2 %v1499_v24, %s1352_s5 }
 0x1c8   :  { %826 = vrot.lane.b32.xlu0 %v1499_v24, %s1351_s20 }
 0x1e2   :  { %740 = vmax.xlane.f32.xlu1 %v739_v18 }
 0x201   :  { %v239_v12 = vpop.xlane.xlu0 %238 }
 0x202   :  { %v240_v38 = vsub.f32 %v1535_v50, %v239_v12 }
 0x204   :  { %v241_v43 = vmul.f32 1.442695, %v240_v38 }
 0x20a   :  { %v321_v19 = vpop.xlane.xlu2 %320 }
 0x20b   :  { %v322_v20 = vsub.f32 %v318_v54, %v321_v19 }
 0x20d   :  { %v323_v21 = vmul.f32 1.442695, %v322_v20 }
 0x20f   :  { %1246 = vpow2.f32 %v323_v21  ;;  %v402_v22 = vpop.xlane.xlu0 %401 }
 0x210   :  { %v403_v23 = vsub.f32 %v399_v59, %v402_v22 }
 0x212   :  { %v404_v25 = vmul.f32 1.442695, %v403_v23  ;;  %v488_v26 = vpop.permute.xlu2 %487  ;;  %v480_v24 = vpop.xlane.xlu1 %479 }
 0x213   :  { %v481_v27 = vsub.f32 %v477_v62, %v480_v24  ;;  %508 = vmatpush.msrb.mxu3 %v488_v26 }
 0x214   :  { %1248 = vpow2.f32 %v404_v25 }
 0x215   :  { %v1247_v28 = vpop.eup %1246  ;;  %v482_v30 = vmul.f32 1.442695, %v481_v27 }
 0x216   :  { %1192 = vmatmul.msk.f32.vlgmr.msra.gmra.mxu3 %vm210_vm1, %v1247_v28  ;;  %v325_v31 = vsel %vm210_vm1, %v1247_v28, 0.0 }
 0x217   :  { %1250 = vpow2.f32 %v482_v30  ;;  %689 = vmatpush.msra.mxu3 %v1239_v29  ;;  %326 = vadd.xlane.f32.xlu2 %v325_v31  ;;  %v578_v32 = vpop.xlane.xlu0 %577 }
 0x218   :  { %v579_v33 = vsub.f32 %v575_v3, %v578_v32 }
 0x21a   :  { %v1249_v34 = vpop.eup %1248  ;;  %v580_v35 = vmul.f32 1.442695, %v579_v33  ;;  %v410_v41 = vpop.permute.xlu2 %409 }
 0x21b   :  { %v406_v36 = vsel %vm210_vm1, %v1249_v34, 0.0 }
 0x21c   :  { %1252 = vpow2.f32 %v580_v35  ;;  %407 = vadd.xlane.f32.xlu0 %v406_v36 }
 0x21d   :  { %v1251_v37 = vpop.eup %1250 }
 0x21e   :  { %1198 = vmatmul.msk.f32.vlgmr.msrb.gmra.mxu3 %vm210_vm1, %v1251_v37  ;;  %v484_v39 = vsel %vm210_vm1, %v1251_v37, 0.0 }
 0x21f   :  { %v660_v40 = vpop.xlane.xlu0 %659  ;;  %485 = vadd.xlane.f32.xlu1 %v484_v39 }
 0x220   :  { %v661_v42 = vsub.f32 %v1553_v6, %v660_v40 }
 0x222   :  { %v1253_v44 = vpop.eup %1252  ;;  %v662_v45 = vmul.f32 1.442695, %v661_v42  ;;  %v586_v50 = vpop.permute.xlu2 %585 }
 0x223   :  { %v582_v46 = vsel %vm210_vm1, %v1253_v44, 0.0 }
 0x224   :  { %1254 = vpow2.f32 %v662_v45  ;;  %583 = vadd.xlane.f32.xlu0 %v582_v46 }
 0x225   :  { %1256 = vpow2.f32 %v241_v43 }
 0x227   :  { %v819_v47 = vpop.xlane.xlu0 %818 }
 0x228   :  { %v820_v48 = vsub.f32 %v1560_v10, %v819_v47 }
 0x22a   :  { %v1255_v49 = vpop.eup %1254  ;;  %v821_v51 = vmul.f32 1.442695, %v820_v48  ;;  %v247_v52 = vpop.permute.xlu1 %246 }
 0x22b   :  { %v1257_v53 = vpop.eup %1256  ;;  %267 = vmatpush.msrb.mxu1 %v247_v52  ;;  %1204 = vmatmul.msk.f32.vlgmr.msra.gmra.mxu3 %vm210_vm1, %v1255_v49  ;;  %v664_v54 = vsel %vm210_vm1, %v1255_v49, 0.0  ;;  %v749_v57 = vpop.permute.xlu2 %748 }
 0x22c   :  { %1258 = vpow2.f32 %v821_v51  ;;  %665 = vadd.xlane.f32.xlu1 %v664_v54  ;;  %1189 = vmatmul.msk.f32.vlgmr.msrb.gmra.mxu1 %vm210_vm1, %v1257_v53  ;;  %v243_v0 = vsel %vm210_vm1, %v1257_v53, 0.0 }
 0x22d   :  { %430 = vmatpush.msra.mxu1 %v410_v41 }
 0x22f   :  { %606 = vmatpush.msrb.mxu1 %v586_v50 }
 0x232   :  { %v1259_v55 = vpop.eup %1258 }
 0x233   :  { %v823_v56 = vsel %vm210_vm1, %v1259_v55, 0.0 }
 0x234   :  { %824 = vadd.xlane.f32.xlu2 %v823_v56  ;;  %1195 = vmatmul.msk.f32.vlgmr.msra.gmra.mxu1 %vm210_vm1, %v1249_v34 }
 0x235   :  { %769 = vmatpush.msra.mxu1 %v749_v57 }
 0x23a   :  { %v827_v58 = vpop.permute.xlu0 %826 }
 0x23b   :  { %847 = vmatpush.msrb.mxu3 %v827_v58 }
 0x23c   :  { %1201 = vmatmul.msk.f32.vlgmr.msrb.gmra.mxu1 %vm210_vm1, %v1253_v44  ;;  %1210 = vmatmul.msk.f32.vlgmr.msrb.gmra.mxu3 %vm210_vm1, %v1259_v55 }
 0x255   :  { %v741_v59 = vpop.xlane.xlu1 %740 }
 0x256   :  { %v742_v60 = vsub.f32 %v1571_v17, %v741_v59 }
 0x258   :  { %v743_v61 = vmul.f32 1.442695, %v742_v60 }
 0x25a   :  { %1260 = vpow2.f32 %v743_v61 }
 0x260   :  { %v1261_v62 = vpop.eup %1260 }
 0x261   :  { %1207 = vmatmul.msk.f32.vlgmr.msra.gmra.mxu1 %vm210_vm1, %v1261_v62  ;;  %v745_v63 = vsel %vm210_vm1, %v1261_v62, 0.0 }
 0x262   :  { %746 = vadd.xlane.f32.xlu1 %v745_v63 }
 0x26a   :  { %244 = vadd.xlane.f32.xlu1 %v243_v0 }
 0x28a   :  { %v327_v1 = vpop.xlane.xlu2 %326 }
 0x28b   :  { %1262 = vrcp.f32 %v327_v1  ;;  %v366_v7 = vand.u32 2147483648, %v327_v1  ;;  %v364_v9 = vand.u32 2147483647, %v327_v1  ;;  %vm360_vm4 = vweird.f32 %v327_v1 }
 0x28d   :  { %v367_v14 = vor.u32 1.1754944e-38, %v366_v7  ;;  %vm365_vm6 = vcmp.eq.f32.partialorder %v364_v9, 8.507059e+37 }
 0x28f   :  { %v1595_v4 = vpop.xlane.xlu0 %407 }
 0x290   :  { %v446_v42 = vand.u32 2147483648, %v1595_v4  ;;  %vm440_vm13 = vweird.f32 %v1595_v4  ;;  %v444_v43 = vand.u32 2147483647, %v1595_v4 }
 0x291   :  { %v1263_v2 = vpop.eup %1262 }
 0x292   :  { %v356_v3 = vmul.f32 %v1263_v2, %v327_v1  ;;  %v486_v5 = vpop.xlane.xlu1 %485  ;;  %vm361_vm3 = vweird.f32 %v1263_v2  ;;  %v447_v51 = vor.u32 1.1754944e-38, %v446_v42 }
 0x293   :  { %1264 = vrcp.f32 %v486_v5  ;;  %vm362_vm5 = vmor %vm360_vm4, %vm361_vm3  ;;  %v524_v20 = vand.u32 2147483648, %v486_v5  ;;  %v522_v23 = vand.u32 2147483647, %v486_v5  ;;  %vm518_vm8 = vweird.f32 %v486_v5 }
 0x294   :  { %v357_v6 = vsub.f32 1.0, %v356_v3  ;;  %1266 = vrcp.f32 %v1595_v4  ;;  %vm445_vm4 = vcmp.eq.f32.partialorder %v444_v43, 8.507059e+37 }
 0x295   :  { %v525_v24 = vor.u32 1.1754944e-38, %v524_v20  ;;  %vm523_vm10 = vcmp.eq.f32.partialorder %v522_v23, 8.507059e+37  ;;  %v885_v20 = vld [vmem:[%s1760_s7 + $0x8] sm:$0xff] }
 0x296   :  { %v358_v8 = vmul.f32 %v1263_v2, %v357_v6 }
 0x298   :  { %v359_v10 = vadd.f32 %v1263_v2, %v358_v8 }
 0x299   :  { %v1265_v11 = vpop.eup %1264  ;;  %v352_v13 = vpop.f32.mrf.mxu3 }
 0x29a   :  { %v514_v15 = vmul.f32 %v1265_v11, %v486_v5  ;;  %v363_v16 = vsel %vm362_vm5, %v1263_v2, %v359_v10  ;;  %v1267_v17 = vpop.eup %1266  ;;  %vm519_vm7 = vweird.f32 %v1265_v11 }
 0x29b   :  { %v368_v18 = vsel %vm365_vm6, %v367_v14, %v363_v16  ;;  %v436_v21 = vmul.f32 %v1267_v17, %v1595_v4  ;;  %vm520_vm9 = vmor %vm518_vm8, %vm519_vm7  ;;  %vm441_vm11 = vweird.f32 %v1267_v17 }
 0x29c   :  { %v515_v12 = vsub.f32 1.0, %v514_v15  ;;  %v369_v19 = vmul.f32 %v368_v18, %v352_v13  ;;  %vm1606_vm15 = vmor %vm440_vm13, %vm441_vm11 }
 0x29d   :  { %v437_v27 = vsub.f32 1.0, %v436_v21 }
 0x29e   :  { %529 = vrot.lane.b32.xlu2 %v369_v19, %s1342_s24  ;;  %v516_v22 = vmul.f32 %v1265_v11, %v515_v12  ;;  %v887_v12 = vld [vmem:[%s1760_s7 + $0x18] sm:$0xff]  ;;  %v886_v19 = vld [vmem:[%s1760_s7 + $0x10] sm:$0xff] }
 0x29f   :  { %v666_v25 = vpop.xlane.xlu1 %665  ;;  %v438_v33 = vmul.f32 %v1267_v17, %v437_v27  ;;  %906 = vmatpush.msrb.mxu0 %v887_v12 }
 0x2a0   :  { %1268 = vrcp.f32 %v666_v25  ;;  %v517_v26 = vadd.f32 %v1265_v11, %v516_v22  ;;  %v705_v38 = vand.u32 2147483648, %v666_v25  ;;  %v703_v41 = vand.u32 2147483647, %v666_v25  ;;  %v884_v22 = vld [vmem:[%s1760_s7] sm:$0xff] }
 0x2a1   :  { %v510_v29 = vpop.f32.mrf.mxu3  ;;  %v439_v39 = vadd.f32 %v1267_v17, %v438_v33  ;;  %vm699_vm14 = vweird.f32 %v666_v25  ;;  %907 = vmatpush.msrb.mxu0 %v886_v19 }
 0x2a2   :  { %v521_v28 = vsel %vm520_vm9, %v1265_v11, %v517_v26  ;;  %v706_v47 = vor.u32 1.1754944e-38, %v705_v38  ;;  %vm704_vm3 = vcmp.eq.f32.partialorder %v703_v41, 8.507059e+37 }
 0x2a3   :  { %v526_v30 = vsel %vm523_vm10, %v525_v24, %v521_v28  ;;  %v443_v48 = vsel %vm1606_vm15, %v1267_v17, %v439_v39  ;;  %908 = vmatpush.msrb.mxu0 %v885_v20 }
 0x2a4   :  { %v527_v31 = vmul.f32 %v526_v30, %v510_v29  ;;  %v448_v57 = vsel %vm445_vm4, %v447_v51, %v443_v48  ;;  %vm543_vm4 = vcmask 195584  }
 0x2a5   :  { %909 = vmatpush.msrb.mxu0 %v884_v22  ;;  %v991_v22 = vld [vmem:[%s1764_s11 + $0x18] sm:$0xff] }
 0x2a6   :  { %v1269_v32 = vpop.eup %1268  ;;  %537 = vrot.lane.b32.xlu0 %v527_v31, %s1354_s22  ;;  %v584_v31 = vpop.xlane.xlu0 %583  ;;  %1014 = vmatpush.msrb.mxu1 %v991_v22  ;;  %v1114_v22 = vld [vmem:[%s1766_s13 + $0x8] sm:$0xff] }
 0x2a7   :  { %v695_v34 = vmul.f32 %v1269_v32, %v666_v25  ;;  %v825_v35 = vpop.xlane.xlu2 %824  ;;  %vm700_vm12 = vweird.f32 %v1269_v32 }
 0x2a8   :  { %1270 = vrcp.f32 %v825_v35  ;;  %vm701_vm2 = vmor %vm699_vm14, %vm700_vm12  ;;  %v863_v61 = vand.u32 2147483648, %v825_v35  ;;  %vm857_vm6 = vweird.f32 %v825_v35  ;;  %v861_v62 = vand.u32 2147483647, %v825_v35 }
 0x2a9   :  { %v696_v36 = vsub.f32 1.0, %v695_v34  ;;  %v1601_v37 = vpop.f32.mrf.mxu1 }
 0x2aa   :  { %v864_v0 = vor.u32 1.1754944e-38, %v863_v61  ;;  %vm862_vm8 = vcmp.eq.f32.partialorder %v861_v62, 8.507059e+37 }
 0x2ab   :  { %v697_v40 = vmul.f32 %v1269_v32, %v696_v36 }
 0x2ad   :  { %v698_v44 = vadd.f32 %v1269_v32, %v697_v40 }
 0x2ae   :  { %v1271_v46 = vpop.eup %1270  ;;  %v691_v52 = vpop.f32.mrf.mxu3 }
 0x2af   :  { %v853_v49 = vmul.f32 %v1271_v46, %v825_v35  ;;  %v702_v50 = vsel %vm701_vm2, %v1269_v32, %v698_v44  ;;  %vm858_vm5 = vweird.f32 %v1271_v46 }
 0x2b0   :  { %v707_v53 = vsel %vm704_vm3, %v706_v47, %v702_v50  ;;  %vm859_vm7 = vmor %vm857_vm6, %vm858_vm5  ;;  %vm541_vm3 = vcmask 130048   ;;  %vm616_vm6 = vweird.f32 %v584_v31  ;;  %v620_v47 = vand.u32 2147483647, %v584_v31 }
 0x2b1   :  { %v854_v54 = vsub.f32 1.0, %v853_v49  ;;  %v708_v55 = vmul.f32 %v707_v53, %v691_v52  ;;  %v432_v56 = vpop.f32.mrf.mxu1 }
 0x2b2   :  { %v449_v58 = vmul.f32 %v448_v57, %v432_v56 }
 0x2b3   :  { %868 = vrot.lane.b32.xlu2 %v708_v55, %s1342_s24  ;;  %v855_v59 = vmul.f32 %v1271_v46, %v854_v54 }
 0x2b4   :  { %533 = vrot.lane.b32.xlu1 %v449_v58, %s1355_s25  ;;  %v882_v58 = vld [vmem:[%s1753_s0] sm:$0xff] }
 0x2b5   :  { %v856_v60 = vadd.f32 %v1271_v46, %v855_v59  ;;  %v1241_v59 = vld [vmem:[%s1761_s8] ss:$0 sm:$0xff] }
 0x2b7   :  { %v860_v63 = vsel %vm859_vm7, %v1271_v46, %v856_v60 }
 0x2b8   :  { %v865_v2 = vsel %vm862_vm8, %v864_v0, %v860_v63  ;;  %vm621_vm8 = vcmp.eq.f32.partialorder %v620_v47, 8.507059e+37  ;;  %v883_v0 = vld [vmem:[%s1753_s0 + $0x8] sm:$0xff]  ;;  %s1166_s0 = sshll.u32 %s1768_s15, 4  ;;  %s1167_s0 = int_to_ptr.hbm [resolvable:$true] %s1166_s0 }
 0x2b9   :  { %v1615_v7 = vpop.f32.mrf.mxu1 }
 0x2bf   :  { %v849_v1 = vpop.f32.mrf.mxu3 }
 0x2c0   :  { %v866_v3 = vmul.f32 %v865_v2, %v849_v1 }
 0x2c2   :  { %876 = vrot.lane.b32.xlu1 %v866_v3, %s1354_s22 }
 0x2d5   :  { %v747_v4 = vpop.xlane.xlu1 %746 }
 0x2d6   :  { %1272 = vrcp.f32 %v747_v4  ;;  %v785_v9 = vand.u32 2147483648, %v747_v4  ;;  %v783_v11 = vand.u32 2147483647, %v747_v4  ;;  %vm779_vm10 = vweird.f32 %v747_v4 }
 0x2d8   :  { %v786_v14 = vor.u32 1.1754944e-38, %v785_v9  ;;  %vm784_vm12 = vcmp.eq.f32.partialorder %v783_v11, 8.507059e+37 }
 0x2dc   :  { %v1273_v5 = vpop.eup %1272 }
 0x2dd   :  { %v775_v6 = vmul.f32 %v1273_v5, %v747_v4  ;;  %vm780_vm9 = vweird.f32 %v1273_v5  ;;  %v245_v21 = vpop.xlane.xlu1 %244 }
 0x2de   :  { %vm781_vm11 = vmor %vm779_vm10, %vm780_vm9  ;;  %v771_v16 = vpop.f32.mrf.mxu1  ;;  %1274 = vrcp.f32 %v245_v21  ;;  %v283_v28 = vand.u32 2147483648, %v245_v21  ;;  %vm277_vm14 = vweird.f32 %v245_v21  ;;  %v281_v29 = vand.u32 2147483647, %v245_v21 }
 0x2df   :  { %v776_v8 = vsub.f32 1.0, %v775_v6  ;;  %1276 = vrcp.f32 %v584_v31 }
 0x2e0   :  { %v284_v32 = vor.u32 1.1754944e-38, %v283_v28  ;;  %vm282_vm2 = vcmp.eq.f32.partialorder %v281_v29, 8.507059e+37 }
 0x2e1   :  { %v777_v10 = vmul.f32 %v1273_v5, %v776_v8 }
 0x2e3   :  { %v778_v13 = vadd.f32 %v1273_v5, %v777_v10 }
 0x2e4   :  { %v1275_v23 = vpop.eup %1274 }
 0x2e5   :  { %v782_v15 = vsel %vm781_vm11, %v1273_v5, %v778_v13  ;;  %v273_v25 = vmul.f32 %v1275_v23, %v245_v21  ;;  %vm278_vm13 = vweird.f32 %v1275_v23  ;;  %v1277_v42 = vpop.eup %1276  ;;  %v1356_v5 = vmov 32.0  }
 0x2e6   :  { %v787_v17 = vsel %vm784_vm12, %v786_v14, %v782_v15  ;;  %vm279_vm15 = vmor %vm277_vm14, %vm278_vm13  ;;  %v612_v43 = vmul.f32 %v1277_v42, %v584_v31  ;;  %vm617_vm5 = vweird.f32 %v1277_v42  ;;  %1278 = vrcp.f32 %v1356_v5 }
 0x2e7   :  { %v788_v18 = vmul.f32 %v787_v17, %v771_v16  ;;  %v274_v26 = vsub.f32 1.0, %v273_v25  ;;  %vm618_vm7 = vmor %vm616_vm6, %vm617_vm5  ;;  %v989_v25 = vld [vmem:[%s1764_s11 + $0x8] sm:$0xff] }
 0x2e8   :  { %v613_v44 = vsub.f32 1.0, %v612_v43 }
 0x2e9   :  { %872 = vrot.lane.b32.xlu0 %v788_v18, %s1355_s25  ;;  %v275_v24 = vmul.f32 %v1275_v23, %v274_v26  ;;  %v988_v26 = vld [vmem:[%s1764_s11] sm:$0xff] }
 0x2ea   :  { %v614_v45 = vmul.f32 %v1277_v42, %v613_v44 }
 0x2eb   :  { %v276_v27 = vadd.f32 %v1275_v23, %v275_v24 }
 0x2ec   :  { %v615_v46 = vadd.f32 %v1277_v42, %v614_v45  ;;  %v1279_v6 = vpop.eup %1278 }
 0x2ed   :  { %v280_v30 = vsel %vm279_vm15, %v1275_v23, %v276_v27  ;;  %v990_v23 = vld [vmem:[%s1764_s11 + $0x10] sm:$0xff] }
 0x2ee   :  { %v285_v33 = vsel %vm282_vm2, %v284_v32, %v280_v30  ;;  %v619_v48 = vsel %vm618_vm7, %v1277_v42, %v615_v46  ;;  %1015 = vmatpush.msrb.mxu1 %v990_v23 }
 0x2ef   :  { %v286_v35 = vmul.f32 %v285_v33, %v1601_v37  ;;  %v622_v37 = vand.u32 2147483648, %v584_v31 }
 0x2f0   :  { %1016 = vmatpush.msrb.mxu1 %v989_v25 }
 0x2f1   :  { %v623_v49 = vor.u32 1.1754944e-38, %v622_v37 }
 0x2f2   :  { %1017 = vmatpush.msrb.mxu1 %v988_v26  ;;  %v1113_v26 = vld [vmem:[%s1766_s13] sm:$0xff] }
 0x2f3   :  { %v624_v50 = vsel %vm621_vm8, %v623_v49, %v619_v48 }
 0x2f4   :  { %v625_v52 = vmul.f32 %v624_v50, %v1615_v7  ;;  %v932_v7 = vmul.f32 32.0, %v1279_v6 }
 0x2f6   :  { %v933_v8 = vsub.f32 1.0, %v932_v7 }
 0x2f8   :  { %v530_v34 = vpop.permute.xlu2 %529  ;;  %v934_v9 = vmul.f32 %v1279_v6, %v933_v8 }
 0x2f9   :  { %v540_v36 = vsel %vm210_vm1, %v286_v35, %v530_v34  ;;  %v1242_v35 = vld [vmem:[%s1762_s9] ss:$0 sm:$0xff] }
 0x2fa   :  { %v935_v10 = vadd.f32 %v1279_v6, %v934_v9  ;;  %v1119_v9 = vld [vmem:[%s1766_s13 + $0x30] sm:$0xff] }
 0x30d   :  { %v869_v51 = vpop.permute.xlu2 %868 }
 0x30e   :  { %v879_v53 = vsel %vm210_vm1, %v625_v52, %v869_v51  ;;  %vm936_vm1 = vweird.f32 %v1279_v6 }
 0x30f   :  { %v937_v11 = vsel %vm936_vm1, %v1279_v6, %v935_v10  ;;  %v1120_v6 = vld [vmem:[%s1766_s13 + $0x38] sm:$0xff] }
 0x318   :  { %v538_v39 = vpop.permute.xlu0 %537 }
 0x326   :  { %v534_v38 = vpop.permute.xlu1 %533 }
 0x327   :  { %v542_v40 = vsel %vm541_vm3, %v540_v36, %v534_v38 }
 0x328   :  { %v544_v41 = vsel %vm543_vm4, %v542_v40, %v538_v39  ;;  %v1243_v39 = vld [vmem:[%s1763_s10] ss:$0 sm:$0xff] }
 0x329   :  { %1211 = vmatmul.msk.f32.vlgmr.msrb.gmra.mxu0 %vm77_vm0, %v544_v41 }
 0x334   :  { %v877_v55 = vpop.permute.xlu1 %876 }
 0x35b   :  { %v873_v54 = vpop.permute.xlu0 %872 }
 0x35c   :  { %v880_v56 = vsel %vm541_vm3, %v879_v53, %v873_v54  ;;  %v1128_v54 = vld [vmem:[%s1766_s13 + $0x78] sm:$0xff] }
 0x35d   :  { %v881_v57 = vsel %vm543_vm4, %v880_v56, %v877_v55  ;;  %1133 = vmatpush.msra.mxu2 %v1128_v54  ;;  %v1127_v55 = vld [vmem:[%s1766_s13 + $0x70] sm:$0xff]  ;;  %v1126_v56 = vld [vmem:[%s1766_s13 + $0x68] sm:$0xff] }
 0x35e   :  { %1212 = vmatmul.msk.f32.gmra.mxu0 %vm77_vm0, %v881_v57  ;;  %v1693_v57 = vld [vmem:[%s1765_s12] ss:$0 sm:$0xff] }
 0x35f   :  { %1134 = vmatpush.msra.mxu2 %v1127_v55 }
 0x361   :  { %1135 = vmatpush.msra.mxu2 %v1126_v56 }
 0x3a6   :  { %v911_v60 = vpop.f32.mrf.mxu0 }
 0x3a7   :  { %v917_v61 = vadd.f32 %v911_v60, %v882_v58  ;;  %v1125_v58 = vld [vmem:[%s1766_s13 + $0x60] sm:$0xff] }
 0x3a8   :  { %1136 = vmatpush.msra.mxu2 %v1125_v58 }
 0x3a9   :  { %v1646_v62 = vadd.f32 %v1241_v59, %v917_v61 }
 0x3ab   :  { %v925_v63 = vsel %vm77_vm0, %v1646_v62, 0.0 }
 0x3ac   :  { %926 = vadd.xlane.f32.xlu2 %v925_v63  ;;  %v1123_v63 = vld [vmem:[%s1766_s13 + $0x50] sm:$0xff] }
 0x3db   :  { %v914_v1 = vpop.f32.mrf.mxu0 }
 0x3dc   :  { %v918_v2 = vadd.f32 %v914_v1, %v883_v0  ;;  %v1122_v1 = vld [vmem:[%s1766_s13 + $0x48] sm:$0xff] }
 0x3de   :  { %v1653_v3 = vadd.f32 %v1241_v59, %v918_v2  ;;  %v1124_v59 = vld [vmem:[%s1766_s13 + $0x58] sm:$0xff] }
 0x3df   :  { %1137 = vmatpush.msra.mxu2 %v1124_v59 }
 0x3e0   :  { %v928_v4 = vsel %vm77_vm0, %v1653_v3, 0.0 }
 0x3e1   :  { %929 = vadd.xlane.f32.xlu0 %v928_v4  ;;  %1138 = vmatpush.msra.mxu2 %v1123_v63  ;;  %v1121_v4 = vld [vmem:[%s1766_s13 + $0x40] sm:$0xff] }
 0x3e3   :  { %1139 = vmatpush.msra.mxu2 %v1122_v1 }
 0x3e5   :  { %1140 = vmatpush.msra.mxu2 %v1121_v4 }
 0x3e7   :  { %1141 = vmatpush.msra.mxu2 %v1120_v6 }
 0x3e9   :  { %1142 = vmatpush.msra.mxu2 %v1119_v9 }
 0x41f   :  { %v927_v13 = vpop.xlane.xlu2 %926 }
 0x420   :  { %v938_v14 = vmul.f32 %v937_v11, %v927_v13  ;;  %v1118_v13 = vld [vmem:[%s1766_s13 + $0x28] sm:$0xff] }
 0x421   :  { %1143 = vmatpush.msra.mxu2 %v1118_v13 }
 0x422   :  { %v940_v15 = vsub.f32 %v1646_v62, %v938_v14 }
 0x424   :  { %v942_v16 = vmul.f32 %v940_v15, %v940_v15 }
 0x426   :  { %v944_v17 = vsel %vm77_vm0, %v942_v16, 0.0  ;;  %v1117_v16 = vld [vmem:[%s1766_s13 + $0x20] sm:$0xff] }
 0x427   :  { %945 = vadd.xlane.f32.xlu1 %v944_v17  ;;  %1144 = vmatpush.msra.mxu2 %v1117_v16 }
 0x454   :  { %v930_v18 = vpop.xlane.xlu0 %929 }
 0x455   :  { %v939_v12 = vmul.f32 %v937_v11, %v930_v18  ;;  %v1116_v18 = vld [vmem:[%s1766_s13 + $0x18] sm:$0xff] }
 0x456   :  { %1145 = vmatpush.msra.mxu2 %v1116_v18 }
 0x457   :  { %v941_v19 = vsub.f32 %v1653_v3, %v939_v12 }
 0x459   :  { %v943_v20 = vmul.f32 %v941_v19, %v941_v19 }
 0x45b   :  { %v947_v21 = vsel %vm77_vm0, %v943_v20, 0.0  ;;  %v1115_v20 = vld [vmem:[%s1766_s13 + $0x10] sm:$0xff] }
 0x45c   :  { %948 = vadd.xlane.f32.xlu2 %v947_v21  ;;  %1146 = vmatpush.msra.mxu2 %v1115_v20 }
 0x45e   :  { %1147 = vmatpush.msra.mxu2 %v1114_v22 }
 0x460   :  { %1148 = vmatpush.msra.mxu2 %v1113_v26 }
 0x49a   :  { %v946_v24 = vpop.xlane.xlu1 %945 }
 0x49b   :  { %v950_v27 = vmul.f32 %v946_v24, %v937_v11 }
 0x49d   :  { %v952_v28 = vadd.f32 1e-05, %v950_v27 }
 0x49f   :  { %1280 = vrsqrt.f32 %v952_v28  ;;  %vm960_vm10 = vweird.f32 %v952_v28 }
 0x4a5   :  { %v1281_v29 = vpop.eup %1280 }
 0x4a6   :  { %v955_v30 = vmul.f32 %v1281_v29, %v952_v28  ;;  %vm961_vm9 = vweird.f32 %v1281_v29 }
 0x4a7   :  { %vm962_vm11 = vmor %vm960_vm10, %vm961_vm9 }
 0x4a8   :  { %v956_v31 = vmul.f32 %v1281_v29, %v955_v30 }
 0x4aa   :  { %v957_v32 = vmul.f32 0.5, %v956_v31 }
 0x4ac   :  { %v958_v33 = vsub.f32 1.5, %v957_v32 }
 0x4ae   :  { %v959_v34 = vmul.f32 %v1281_v29, %v958_v33 }
 0x4b0   :  { %v963_v36 = vsel %vm962_vm11, %v1281_v29, %v959_v34 }
 0x4b1   :  { %v974_v38 = vmul.f32 %v963_v36, %v940_v15 }
 0x4b3   :  { %v980_v40 = vmul.f32 %v1242_v35, %v974_v38 }
 0x4b5   :  { %v986_v41 = vadd.f32 %v1243_v39, %v980_v40 }
 0x4b7   :  { %1213 = vmatmul.msk.f32.vlgmr.msrb.gmra.mxu1 %vm77_vm0, %v986_v41 }
 0x4cf   :  { %v949_v42 = vpop.xlane.xlu2 %948 }
 0x4d0   :  { %v951_v43 = vmul.f32 %v949_v42, %v937_v11 }
 0x4d2   :  { %v953_v44 = vadd.f32 1e-05, %v951_v43 }
 0x4d4   :  { %1282 = vrsqrt.f32 %v953_v44  ;;  %vm970_vm13 = vweird.f32 %v953_v44 }
 0x4da   :  { %v1283_v45 = vpop.eup %1282 }
 0x4db   :  { %v965_v46 = vmul.f32 %v1283_v45, %v953_v44  ;;  %vm971_vm12 = vweird.f32 %v1283_v45 }
 0x4dc   :  { %vm972_vm14 = vmor %vm970_vm13, %vm971_vm12 }
 0x4dd   :  { %v966_v37 = vmul.f32 %v1283_v45, %v965_v46 }
 0x4df   :  { %v967_v47 = vmul.f32 0.5, %v966_v37 }
 0x4e1   :  { %v968_v48 = vsub.f32 1.5, %v967_v47 }
 0x4e3   :  { %v969_v49 = vmul.f32 %v1283_v45, %v968_v48 }
 0x4e5   :  { %v973_v50 = vsel %vm972_vm14, %v1283_v45, %v969_v49 }
 0x4e6   :  { %v975_v51 = vmul.f32 %v973_v50, %v941_v19 }
 0x4e8   :  { %v981_v52 = vmul.f32 %v1242_v35, %v975_v51 }
 0x4ea   :  { %v987_v53 = vadd.f32 %v1243_v39, %v981_v52 }
 0x4ec   :  { %1214 = vmatmul.msk.f32.gmra.mxu1 %vm77_vm0, %v987_v53 }
 0x534   :  { %v1019_v60 = vpop.f32.mrf.mxu1 }
 0x535   :  { %v1702_v61 = vadd.f32 %v1693_v57, %v1019_v60 }
 0x537   :  { %v1027_v0 = vmul.f32 0.70710677, %v1702_v61  ;;  %v1025_v47 = vmul.f32 0.5, %v1702_v61 }
 0x539   :  { %v1029_v2 = vmul.f32 %v1027_v0, %v1027_v0 }
 0x53b   :  { %v1030_v5 = vmin.f32 %v1029_v2, 16.0 }
 0x53d   :  { %v1031_v7 = vmul.f32 2.1237322e-06, %v1030_v5  ;;  %v1042_v8 = vmul.f32 3.8918573e-05, %v1030_v5 }
 0x53f   :  { %v1032_v10 = vadd.f32 0.00028619796, %v1031_v7  ;;  %v1043_v11 = vadd.f32 0.001143296, %v1042_v8 }
 0x541   :  { %v1033_v14 = vmul.f32 %v1032_v10, %v1030_v5  ;;  %v1044_v15 = vmul.f32 %v1043_v11, %v1030_v5 }
 0x543   :  { %v1045_v17 = vadd.f32 0.014752088, %v1044_v15  ;;  %v1034_v12 = vadd.f32 0.0036580483, %v1033_v14 }
 0x545   :  { %v1046_v19 = vmul.f32 %v1045_v17, %v1030_v5  ;;  %v1035_v23 = vmul.f32 %v1034_v12, %v1030_v5 }
 0x547   :  { %v1047_v21 = vadd.f32 0.112945676, %v1046_v19  ;;  %v1036_v27 = vadd.f32 0.05243302, %v1035_v23 }
 0x549   :  { %v1048_v25 = vmul.f32 %v1047_v21, %v1030_v5  ;;  %v1037_v30 = vmul.f32 %v1036_v27, %v1030_v5 }
 0x54b   :  { %v1049_v24 = vadd.f32 0.4994258, %v1048_v25  ;;  %v1038_v31 = vadd.f32 0.18741608, %v1037_v30 }
 0x54d   :  { %v1050_v28 = vmul.f32 %v1049_v24, %v1030_v5  ;;  %v1039_v33 = vmul.f32 %v1038_v31, %v1030_v5 }
 0x54f   :  { %v1051_v29 = vadd.f32 1.0, %v1050_v28  ;;  %v1040_v38 = vadd.f32 1.1283791, %v1039_v33 }
 0x551   :  { %1284 = vrcp.f32 %v1051_v29  ;;  %v1063_v36 = vand.u32 2147483648, %v1051_v29  ;;  %v1061_v40 = vand.u32 2147483647, %v1051_v29  ;;  %vm1057_vm2 = vweird.f32 %v1051_v29 }
 0x552   :  { %v1041_v43 = vmul.f32 %v1040_v38, %v1027_v0 }
 0x553   :  { %v1064_v42 = vor.u32 1.1754944e-38, %v1063_v36  ;;  %vm1062_vm4 = vcmp.eq.f32.partialorder %v1061_v40, 8.507059e+37 }
 0x557   :  { %v1285_v32 = vpop.eup %1284 }
 0x558   :  { %v1053_v34 = vmul.f32 %v1285_v32, %v1051_v29  ;;  %vm1058_vm15 = vweird.f32 %v1285_v32  ;;  %v1245_v29 = vld [vmem:[%s1767_s14] ss:$0 sm:$0xff] }
 0x559   :  { %vm1059_vm3 = vmor %vm1057_vm2, %vm1058_vm15 }
 0x55a   :  { %v1054_v35 = vsub.f32 1.0, %v1053_v34 }
 0x55c   :  { %v1055_v39 = vmul.f32 %v1285_v32, %v1054_v35 }
 0x55e   :  { %v1056_v41 = vadd.f32 %v1285_v32, %v1055_v39 }
 0x560   :  { %v1060_v44 = vsel %vm1059_vm3, %v1285_v32, %v1056_v41 }
 0x561   :  { %v1065_v45 = vsel %vm1062_vm4, %v1064_v42, %v1060_v44 }
 0x562   :  { %v1066_v46 = vmul.f32 %v1065_v45, %v1041_v43 }
 0x564   :  { %v1215_v37 = vclamps-f32 %v1066_v46, 1.0 }
 0x566   :  { %v1109_v48 = vadd.f32 1.0, %v1215_v37 }
 0x568   :  { %v1111_v49 = vmul.f32 %v1109_v48, %v1025_v47 }
 0x569   :  { %v1022_v50 = vpop.f32.mrf.mxu1 }
 0x56a   :  { %v1023_v51 = vadd.f32 %v1693_v57, %v1022_v50  ;;  %1149 = vmatmul.f32.vlgmr.msra.gmra.mxu2 %v1111_v49 }
 0x56c   :  { %v1028_v52 = vmul.f32 0.70710677, %v1023_v51  ;;  %v1026_v24 = vmul.f32 0.5, %v1023_v51 }
 0x56e   :  { %v1069_v53 = vmul.f32 %v1028_v52, %v1028_v52 }
 0x570   :  { %v1070_v54 = vmin.f32 %v1069_v53, 16.0 }
 0x572   :  { %v1071_v55 = vmul.f32 2.1237322e-06, %v1070_v54  ;;  %v1082_v56 = vmul.f32 3.8918573e-05, %v1070_v54 }
 0x574   :  { %v1072_v58 = vadd.f32 0.00028619796, %v1071_v55  ;;  %v1083_v59 = vadd.f32 0.001143296, %v1082_v56 }
 0x576   :  { %v1073_v60 = vmul.f32 %v1072_v58, %v1070_v54  ;;  %v1084_v63 = vmul.f32 %v1083_v59, %v1070_v54 }
 0x578   :  { %v1085_v0 = vadd.f32 0.014752088, %v1084_v63  ;;  %v1074_v1 = vadd.f32 0.0036580483, %v1073_v60 }
 0x57a   :  { %v1086_v2 = vmul.f32 %v1085_v0, %v1070_v54  ;;  %v1075_v61 = vmul.f32 %v1074_v1, %v1070_v54 }
 0x57c   :  { %v1087_v4 = vadd.f32 0.112945676, %v1086_v2  ;;  %v1076_v7 = vadd.f32 0.05243302, %v1075_v61 }
 0x57e   :  { %v1088_v5 = vmul.f32 %v1087_v4, %v1070_v54  ;;  %v1077_v9 = vmul.f32 %v1076_v7, %v1070_v54 }
 0x580   :  { %v1089_v6 = vadd.f32 0.4994258, %v1088_v5  ;;  %v1078_v10 = vadd.f32 0.18741608, %v1077_v9 }
 0x582   :  { %v1090_v8 = vmul.f32 %v1089_v6, %v1070_v54  ;;  %v1079_v13 = vmul.f32 %v1078_v10, %v1070_v54 }
 0x584   :  { %v1091_v57 = vadd.f32 1.0, %v1090_v8  ;;  %v1080_v17 = vadd.f32 1.1283791, %v1079_v13 }
 0x586   :  { %1286 = vrcp.f32 %v1091_v57  ;;  %v1103_v16 = vand.u32 2147483648, %v1091_v57  ;;  %v1101_v12 = vand.u32 2147483647, %v1091_v57  ;;  %vm1097_vm6 = vweird.f32 %v1091_v57 }
 0x587   :  { %v1081_v21 = vmul.f32 %v1080_v17, %v1028_v52 }
 0x588   :  { %v1104_v20 = vor.u32 1.1754944e-38, %v1103_v16  ;;  %vm1102_vm8 = vcmp.eq.f32.partialorder %v1101_v12, 8.507059e+37 }
 0x58c   :  { %v1287_v11 = vpop.eup %1286 }
 0x58d   :  { %v1093_v14 = vmul.f32 %v1287_v11, %v1091_v57  ;;  %vm1098_vm5 = vweird.f32 %v1287_v11 }
 0x58e   :  { %vm1099_vm7 = vmor %vm1097_vm6, %vm1098_vm5 }
 0x58f   :  { %v1094_v15 = vsub.f32 1.0, %v1093_v14 }
 0x591   :  { %v1095_v18 = vmul.f32 %v1287_v11, %v1094_v15 }
 0x593   :  { %v1096_v19 = vadd.f32 %v1287_v11, %v1095_v18 }
 0x595   :  { %v1100_v22 = vsel %vm1099_vm7, %v1287_v11, %v1096_v19 }
 0x596   :  { %v1105_v23 = vsel %vm1102_vm8, %v1104_v20, %v1100_v22 }
 0x597   :  { %v1106_v25 = vmul.f32 %v1105_v23, %v1081_v21 }
 0x599   :  { %v1216_v26 = vclamps-f32 %v1106_v25, 1.0 }
 0x59b   :  { %v1110_v27 = vadd.f32 1.0, %v1216_v26 }
 0x59d   :  { %v1112_v28 = vmul.f32 %v1110_v27, %v1026_v24 }
 0x59f   :  { %1152 = vmatmul.f32.gmra.mxu2 %v1112_v28 }
 0x5ed   :  { %v1150_v30 = vpop.f32.mrf.mxu2 }
 0x5ee   :  { %v1151_v31 = vadd.f32 %v1245_v29, %v1150_v30 }
 0x5f0   :  { %v1156_v32 = vadd.f32 %v1151_v31, %v1646_v62 }
 0x5f2   :  { %1158 = vst.msk [vmem:[#allocation5] sm:$0xff] %vm77_vm0, %v1156_v32 }
 0x622   :  { %v1153_v33 = vpop.f32.mrf.mxu2 }
 0x623   :  { %v1154_v34 = vadd.f32 %v1245_v29, %v1153_v33 }
 0x625   :  { %v1157_v35 = vadd.f32 %v1154_v34, %v1653_v3 }
 0x627   :  { %1159 = vst.msk [vmem:[#allocation5 + $0x8] sm:$0xff] %vm77_vm0, %v1157_v35 }
 0x628   :  { %1172 = dma.vmem_to_hbm [thread:$0]  %s1165_s17, 256, %s1167_s0, [#allocation4], %s1341_s23, %s1341_s23, %s1342_s24  }
 0x629   :  { %1338 = dma.done.wait [#allocation4], 256  }
 0x62a   :  { %1339 = vsyncadd [#allocation4], 4294967040 }
 0x62b   :  { %1177 = vsyncpa [#allocation3], 1 }
 0x62c   :  { %1178 = vsyncpa [#allocation4], 1 }

</bundles_post_ra>
